<compile_context>
chip_gen: v7x
topology: tpu7x:2x2x1
jax: 0.10.0
libtpu: 0.0.40
codegen_flags: <defaults>
</compile_context>

<pallas_src>
import jax
import jax.numpy as jnp
from jax.experimental import pallas as pl
from jax.experimental.pallas import tpu as pltpu


# ----------------------- fused embedding + GRU kernel -------------------------
def encoder_gru_kernel(ids_ref,                      # SMEM (B, T) int32 token ids
                       emb_ref,                      # VMEM (V, E)
                       wir_ref, wiz_ref, win_ref,    # VMEM (E, H) each (W_i*.T)
                       br_ref, bz_ref, bn_ref,       # VMEM (1, H) folded biases
                       bhn_ref,                      # VMEM (1, H) b_hn (inside r*(...))
                       whr_ref, whz_ref, whn_ref,    # VMEM (H, H) each (W_h*.T)
                       out_ref,                      # VMEM (B, T, H)
                       hid_ref,                      # VMEM (1, B, H)
                       pr_ref, pz_ref, pn_ref):      # VMEM scratch (V, H) each
    B, T = ids_ref.shape
    H = out_ref.shape[-1]

    # -- phase 1: per-vocab input projection tables (input proj hoisted out of
    #    the recurrence entirely; one MXU pass per gate) --
    emb = emb_ref[...]
    pr_ref[...] = (jnp.dot(emb, wir_ref[...], preferred_element_type=jnp.float32)
                   + br_ref[...])
    pz_ref[...] = (jnp.dot(emb, wiz_ref[...], preferred_element_type=jnp.float32)
                   + bz_ref[...])
    pn_ref[...] = (jnp.dot(emb, win_ref[...], preferred_element_type=jnp.float32)
                   + bn_ref[...])

    # Hidden weights / bias read once, reused for every timestep.
    whr = whr_ref[...]
    whz = whz_ref[...]
    whn = whn_ref[...]
    bhn = bhn_ref[...]

    def gather(tbl_ref, t):
        # B tiny dynamic-start row loads (token-id gather) -> (B, H)
        return jnp.concatenate(
            [tbl_ref[pl.ds(ids_ref[b, t], 1), :] for b in range(B)], axis=0)

    # -- phase 2: recurrence.  T small & static -> fully unrolled; only the
    #    h @ W_h* matmuls are sequentially dependent. --
    h = jnp.zeros((B, H), jnp.float32)
    for t in range(T):
        gi_r = gather(pr_ref, t)
        gi_z = gather(pz_ref, t)
        gi_n = gather(pn_ref, t)
        hr = jnp.dot(h, whr, preferred_element_type=jnp.float32)
        hz = jnp.dot(h, whz, preferred_element_type=jnp.float32)
        hn = jnp.dot(h, whn, preferred_element_type=jnp.float32)
        r = jax.nn.sigmoid(gi_r + hr)
        z = jax.nn.sigmoid(gi_z + hz)
        n = jnp.tanh(gi_n + r * (hn + bhn))
        h = (1.0 - z) * n + z * h
        out_ref[:, t, :] = h.astype(out_ref.dtype)

    hid_ref[0] = h.astype(hid_ref.dtype)


def encoder_forward(data, emb, wir, wiz, win, br, bz, bn, bhn, whr, whz, whn):
    B, T = data.shape
    V, _ = emb.shape
    H = whr.shape[0]
    vmem = pl.BlockSpec(memory_space=pltpu.MemorySpace.VMEM)
    smem = pl.BlockSpec(memory_space=pltpu.MemorySpace.SMEM)
    out, hidden = pl.pallas_call(
        encoder_gru_kernel,
        out_shape=(jax.ShapeDtypeStruct((B, T, H), jnp.float32),
                   jax.ShapeDtypeStruct((1, B, H), jnp.float32)),
        in_specs=[smem] + [vmem] * 11,
        out_specs=(vmem, vmem),
        scratch_shapes=[pltpu.VMEM((V, H), jnp.float32)] * 3,
    )(data, emb, wir, wiz, win, br, bz, bn, bhn, whr, whz, whn)
    return out, hidden


# ------------------------------ Encoder wrapper -------------------------------
class EncoderPallas:
    def __init__(self, input_size, embed_size, hidden_size, pad_idx, key):
        self.hidden_size = hidden_size
        H = hidden_size
        k0, k1, k2, k3, k4 = jax.random.split(key, 5)
        # nn.Embedding default init: N(0, 1); padding_idx row zeroed.
        emb = jax.random.normal(k0, (input_size, embed_size), jnp.float32)
        self.emb = emb.at[pad_idx].set(0.0)
        # nn.GRU default init: U(-1/sqrt(H), 1/sqrt(H)); gate order [r, z, n].
        s = 1.0 / jnp.sqrt(jnp.float32(hidden_size))
        self.w_ih = jax.random.uniform(k1, (3 * H, embed_size), jnp.float32, -s, s)
        self.w_hh = jax.random.uniform(k2, (3 * H, H), jnp.float32, -s, s)
        self.b_ih = jax.random.uniform(k3, (3 * H,), jnp.float32, -s, s)
        self.b_hh = jax.random.uniform(k4, (3 * H,), jnp.float32, -s, s)
        # NOTE: self.dropout exists in the PyTorch module but is unused in forward().

        # --- pre-transposed / pre-folded kernel parameters (done once) ---
        self.wir = jnp.transpose(self.w_ih[:H])              # (E, H)
        self.wiz = jnp.transpose(self.w_ih[H:2 * H])
        self.win = jnp.transpose(self.w_ih[2 * H:])
        self.br = (self.b_ih[:H] + self.b_hh[:H]).reshape(1, H)
        self.bz = (self.b_ih[H:2 * H] + self.b_hh[H:2 * H]).reshape(1, H)
        self.bn = self.b_ih[2 * H:].reshape(1, H)
        self.bhn = self.b_hh[2 * H:].reshape(1, H)            # stays inside r*(...)
        self.whr = jnp.transpose(self.w_hh[:H])               # (H, H)
        self.whz = jnp.transpose(self.w_hh[H:2 * H])
        self.whn = jnp.transpose(self.w_hh[2 * H:])

    def __call__(self, data):
        # data: (B, T) int32 token ids -> (out (B,T,H), hidden (1,B,H))
        return encoder_forward(
            data, self.emb, self.wir, self.wiz, self.win,
            self.br, self.bz, self.bn, self.bhn,
            self.whr, self.whz, self.whn)


# ---------------------------- pure-JAX reference ------------------------------
def reference(data, enc):
    emb = enc.emb[data]                                     # (B, T, E)
    H = enc.hidden_size

    def step(h, x_t):
        gi = x_t @ enc.w_ih.T + enc.b_ih
        gh = h @ enc.w_hh.T + enc.b_hh
        i_r, i_z, i_n = gi[:, :H], gi[:, H:2 * H], gi[:, 2 * H:]
        h_r, h_z, h_n = gh[:, :H], gh[:, H:2 * H], gh[:, 2 * H:]
        r = jax.nn.sigmoid(i_r + h_r)
        z = jax.nn.sigmoid(i_z + h_z)
        n = jnp.tanh(i_n + r * h_n)
        h_new = (1.0 - z) * n + z * h
        return h_new, h_new

    h0 = jnp.zeros((data.shape[0], H), jnp.float32)
    h_last, out_tbh = jax.lax.scan(step, h0, jnp.transpose(emb, (1, 0, 2)))
    return jnp.transpose(out_tbh, (1, 0, 2)), h_last[None]


if __name__ == "__main__":
    # Small shapes consistent with the module: vocab=16, embed=32, hidden=32,
    # batch=2, seq=8.  pad token index = 0.
    VOCAB, EMBED, HIDDEN, BATCH, SEQ, PAD = 16, 32, 32, 2, 8, 0

    key = jax.random.PRNGKey(0)
    k_param, k_data = jax.random.split(key)
    enc = EncoderPallas(VOCAB, EMBED, HIDDEN, PAD, k_param)

    data = jax.random.randint(k_data, (BATCH, SEQ), 0, VOCAB, dtype=jnp.int32)

    out, hidden = enc(data)
    out, hidden = jax.block_until_ready((out, hidden))

    ref_out, ref_hidden = reference(data, enc)
    assert out.shape == (BATCH, SEQ, HIDDEN)
    assert hidden.shape == (1, BATCH, HIDDEN)
    assert jnp.allclose(out, ref_out, atol=1e-3)
    assert jnp.allclose(hidden, ref_hidden, atol=1e-3)

    print("KERNEL_OK")
</pallas_src>

<mosaic_0001>
module attributes {stable_mosaic.version = 11 : i64} {
  func.func @encoder_gru_kernel(%arg0: memref<2x8xi32, #tpu.memory_space<smem>>, %arg1: memref<16x32xf32, #tpu.memory_space<vmem>>, %arg2: memref<32x32xf32, #tpu.memory_space<vmem>>, %arg3: memref<32x32xf32, #tpu.memory_space<vmem>>, %arg4: memref<32x32xf32, #tpu.memory_space<vmem>>, %arg5: memref<1x32xf32, #tpu.memory_space<vmem>>, %arg6: memref<1x32xf32, #tpu.memory_space<vmem>>, %arg7: memref<1x32xf32, #tpu.memory_space<vmem>>, %arg8: memref<1x32xf32, #tpu.memory_space<vmem>>, %arg9: memref<32x32xf32, #tpu.memory_space<vmem>>, %arg10: memref<32x32xf32, #tpu.memory_space<vmem>>, %arg11: memref<32x32xf32, #tpu.memory_space<vmem>>, %arg12: memref<2x8x32xf32, #tpu.memory_space<vmem>>, %arg13: memref<1x2x32xf32, #tpu.memory_space<vmem>>, %arg14: memref<16x32xf32, #tpu.memory_space<vmem>>, %arg15: memref<16x32xf32, #tpu.memory_space<vmem>>, %arg16: memref<16x32xf32, #tpu.memory_space<vmem>>) attributes {dimension_semantics = [], scalar_prefetch = 0 : i64, scratch_operands = 3 : i64, tpu.core_type = #tpu.core_type<tc>} {
    %c0 = arith.constant 0 : index
    %c0_0 = arith.constant 0 : index
    %0 = vector.load %arg1[%c0, %c0_0] : memref<16x32xf32, #tpu.memory_space<vmem>>, vector<16x32xf32>
    %c0_1 = arith.constant 0 : index
    %c0_2 = arith.constant 0 : index
    %1 = vector.load %arg2[%c0_1, %c0_2] : memref<32x32xf32, #tpu.memory_space<vmem>>, vector<32x32xf32>
    %cst = arith.constant dense<0.000000e+00> : vector<16x32xf32>
    %2 = tpu.matmul %0, %1, %cst {dimension_numbers = #tpu.dot_dimension_numbers<[1], [0], [0], [1], [0, 0, 1, 1], [], []>} : vector<16x32xf32>, vector<32x32xf32>, vector<16x32xf32> -> vector<16x32xf32>
    %c0_3 = arith.constant 0 : index
    %c0_4 = arith.constant 0 : index
    %3 = vector.load %arg5[%c0_3, %c0_4] : memref<1x32xf32, #tpu.memory_space<vmem>>, vector<1x32xf32>
    %4 = vector.broadcast %3 : vector<1x32xf32> to vector<16x32xf32>
    %5 = arith.addf %2, %4 : vector<16x32xf32>
    %c0_5 = arith.constant 0 : index
    %c0_6 = arith.constant 0 : index
    %6 = vector.load %arg14[%c0_5, %c0_6] : memref<16x32xf32, #tpu.memory_space<vmem>>, vector<16x32xf32>
    tpu.vector_store %arg14[%c0_5, %c0_6], %5 {strides = array<i32>} : memref<16x32xf32, #tpu.memory_space<vmem>>, vector<16x32xf32>,
    %c0_7 = arith.constant 0 : index
    %c0_8 = arith.constant 0 : index
    %7 = vector.load %arg3[%c0_7, %c0_8] : memref<32x32xf32, #tpu.memory_space<vmem>>, vector<32x32xf32>
    %cst_9 = arith.constant dense<0.000000e+00> : vector<16x32xf32>
    %8 = tpu.matmul %0, %7, %cst_9 {dimension_numbers = #tpu.dot_dimension_numbers<[1], [0], [0], [1], [0, 0, 1, 1], [], []>} : vector<16x32xf32>, vector<32x32xf32>, vector<16x32xf32> -> vector<16x32xf32>
    %c0_10 = arith.constant 0 : index
    %c0_11 = arith.constant 0 : index
    %9 = vector.load %arg6[%c0_10, %c0_11] : memref<1x32xf32, #tpu.memory_space<vmem>>, vector<1x32xf32>
    %10 = vector.broadcast %9 : vector<1x32xf32> to vector<16x32xf32>
    %11 = arith.addf %8, %10 : vector<16x32xf32>
    %c0_12 = arith.constant 0 : index
    %c0_13 = arith.constant 0 : index
    %12 = vector.load %arg15[%c0_12, %c0_13] : memref<16x32xf32, #tpu.memory_space<vmem>>, vector<16x32xf32>
    tpu.vector_store %arg15[%c0_12, %c0_13], %11 {strides = array<i32>} : memref<16x32xf32, #tpu.memory_space<vmem>>, vector<16x32xf32>,
    %c0_14 = arith.constant 0 : index
    %c0_15 = arith.constant 0 : index
    %13 = vector.load %arg4[%c0_14, %c0_15] : memref<32x32xf32, #tpu.memory_space<vmem>>, vector<32x32xf32>
    %cst_16 = arith.constant dense<0.000000e+00> : vector<16x32xf32>
    %14 = tpu.matmul %0, %13, %cst_16 {dimension_numbers = #tpu.dot_dimension_numbers<[1], [0], [0], [1], [0, 0, 1, 1], [], []>} : vector<16x32xf32>, vector<32x32xf32>, vector<16x32xf32> -> vector<16x32xf32>
    %c0_17 = arith.constant 0 : index
    %c0_18 = arith.constant 0 : index
    %15 = vector.load %arg7[%c0_17, %c0_18] : memref<1x32xf32, #tpu.memory_space<vmem>>, vector<1x32xf32>
    %16 = vector.broadcast %15 : vector<1x32xf32> to vector<16x32xf32>
    %17 = arith.addf %14, %16 : vector<16x32xf32>
    %c0_19 = arith.constant 0 : index
    %c0_20 = arith.constant 0 : index
    %18 = vector.load %arg16[%c0_19, %c0_20] : memref<16x32xf32, #tpu.memory_space<vmem>>, vector<16x32xf32>
    tpu.vector_store %arg16[%c0_19, %c0_20], %17 {strides = array<i32>} : memref<16x32xf32, #tpu.memory_space<vmem>>, vector<16x32xf32>,
    %c0_21 = arith.constant 0 : index
    %c0_22 = arith.constant 0 : index
    %19 = vector.load %arg9[%c0_21, %c0_22] : memref<32x32xf32, #tpu.memory_space<vmem>>, vector<32x32xf32>
    %c0_23 = arith.constant 0 : index
    %c0_24 = arith.constant 0 : index
    %20 = vector.load %arg10[%c0_23, %c0_24] : memref<32x32xf32, #tpu.memory_space<vmem>>, vector<32x32xf32>
    %c0_25 = arith.constant 0 : index
    %c0_26 = arith.constant 0 : index
    %21 = vector.load %arg11[%c0_25, %c0_26] : memref<32x32xf32, #tpu.memory_space<vmem>>, vector<32x32xf32>
    %c0_27 = arith.constant 0 : index
    %c0_28 = arith.constant 0 : index
    %22 = vector.load %arg8[%c0_27, %c0_28] : memref<1x32xf32, #tpu.memory_space<vmem>>, vector<1x32xf32>
    %cst_29 = arith.constant 0.000000e+00 : f32
    %23 = vector.broadcast %cst_29 : f32 to vector<2x32xf32>
    %c0_30 = arith.constant 0 : index
    %c0_31 = arith.constant 0 : index
    %24 = memref.load %arg0[%c0_30, %c0_31] : memref<2x8xi32, #tpu.memory_space<smem>>
    %25 = arith.index_cast %24 : i32 to index
    %c0_32 = arith.constant 0 : index
    %26 = vector.load %arg14[%25, %c0_32] : memref<16x32xf32, #tpu.memory_space<vmem>>, vector<1x32xf32>
    %c1 = arith.constant 1 : index
    %c0_33 = arith.constant 0 : index
    %27 = memref.load %arg0[%c1, %c0_33] : memref<2x8xi32, #tpu.memory_space<smem>>
    %28 = arith.index_cast %27 : i32 to index
    %c0_34 = arith.constant 0 : index
    %29 = vector.load %arg14[%28, %c0_34] : memref<16x32xf32, #tpu.memory_space<vmem>>, vector<1x32xf32>
    %30 = tpu.concatenate %26, %29 in 0 : vector<1x32xf32>, vector<1x32xf32> -> vector<2x32xf32>
    %c0_35 = arith.constant 0 : index
    %c0_36 = arith.constant 0 : index
    %31 = memref.load %arg0[%c0_35, %c0_36] : memref<2x8xi32, #tpu.memory_space<smem>>
    %32 = arith.index_cast %31 : i32 to index
    %c0_37 = arith.constant 0 : index
    %33 = vector.load %arg15[%32, %c0_37] : memref<16x32xf32, #tpu.memory_space<vmem>>, vector<1x32xf32>
    %c1_38 = arith.constant 1 : index
    %c0_39 = arith.constant 0 : index
    %34 = memref.load %arg0[%c1_38, %c0_39] : memref<2x8xi32, #tpu.memory_space<smem>>
    %35 = arith.index_cast %34 : i32 to index
    %c0_40 = arith.constant 0 : index
    %36 = vector.load %arg15[%35, %c0_40] : memref<16x32xf32, #tpu.memory_space<vmem>>, vector<1x32xf32>
    %37 = tpu.concatenate %33, %36 in 0 : vector<1x32xf32>, vector<1x32xf32> -> vector<2x32xf32>
    %c0_41 = arith.constant 0 : index
    %c0_42 = arith.constant 0 : index
    %38 = memref.load %arg0[%c0_41, %c0_42] : memref<2x8xi32, #tpu.memory_space<smem>>
    %39 = arith.index_cast %38 : i32 to index
    %c0_43 = arith.constant 0 : index
    %40 = vector.load %arg16[%39, %c0_43] : memref<16x32xf32, #tpu.memory_space<vmem>>, vector<1x32xf32>
    %c1_44 = arith.constant 1 : index
    %c0_45 = arith.constant 0 : index
    %41 = memref.load %arg0[%c1_44, %c0_45] : memref<2x8xi32, #tpu.memory_space<smem>>
    %42 = arith.index_cast %41 : i32 to index
    %c0_46 = arith.constant 0 : index
    %43 = vector.load %arg16[%42, %c0_46] : memref<16x32xf32, #tpu.memory_space<vmem>>, vector<1x32xf32>
    %44 = tpu.concatenate %40, %43 in 0 : vector<1x32xf32>, vector<1x32xf32> -> vector<2x32xf32>
    %cst_47 = arith.constant dense<0.000000e+00> : vector<2x32xf32>
    %45 = tpu.matmul %23, %19, %cst_47 {dimension_numbers = #tpu.dot_dimension_numbers<[1], [0], [0], [1], [0, 0, 1, 1], [], []>} : vector<2x32xf32>, vector<32x32xf32>, vector<2x32xf32> -> vector<2x32xf32>
    %cst_48 = arith.constant dense<0.000000e+00> : vector<2x32xf32>
    %46 = tpu.matmul %23, %20, %cst_48 {dimension_numbers = #tpu.dot_dimension_numbers<[1], [0], [0], [1], [0, 0, 1, 1], [], []>} : vector<2x32xf32>, vector<32x32xf32>, vector<2x32xf32> -> vector<2x32xf32>
    %cst_49 = arith.constant dense<0.000000e+00> : vector<2x32xf32>
    %47 = tpu.matmul %23, %21, %cst_49 {dimension_numbers = #tpu.dot_dimension_numbers<[1], [0], [0], [1], [0, 0, 1, 1], [], []>} : vector<2x32xf32>, vector<32x32xf32>, vector<2x32xf32> -> vector<2x32xf32>
    %48 = arith.addf %30, %45 : vector<2x32xf32>
    %49 = arith.negf %48 : vector<2x32xf32>
    %50 = math.exp %49 : vector<2x32xf32>
    %cst_50 = arith.constant 1.000000e+00 : f32
    %51 = vector.broadcast %cst_50 : f32 to vector<2x32xf32>
    %52 = arith.addf %51, %50 : vector<2x32xf32>
    %53 = arith.divf %51, %52 : vector<2x32xf32>
    %54 = arith.addf %37, %46 : vector<2x32xf32>
    %55 = arith.negf %54 : vector<2x32xf32>
    %56 = math.exp %55 : vector<2x32xf32>
    %cst_51 = arith.constant 1.000000e+00 : f32
    %57 = vector.broadcast %cst_51 : f32 to vector<2x32xf32>
    %58 = arith.addf %57, %56 : vector<2x32xf32>
    %59 = arith.divf %57, %58 : vector<2x32xf32>
    %60 = vector.broadcast %22 : vector<1x32xf32> to vector<2x32xf32>
    %61 = arith.addf %47, %60 : vector<2x32xf32>
    %62 = arith.mulf %53, %61 : vector<2x32xf32>
    %63 = arith.addf %44, %62 : vector<2x32xf32>
    %64 = math.tanh %63 : vector<2x32xf32>
    %cst_52 = arith.constant 1.000000e+00 : f32
    %65 = vector.broadcast %cst_52 : f32 to vector<2x32xf32>
    %66 = arith.subf %65, %59 : vector<2x32xf32>
    %67 = arith.mulf %66, %64 : vector<2x32xf32>
    %68 = arith.mulf %59, %23 : vector<2x32xf32>
    %69 = arith.addf %67, %68 : vector<2x32xf32>
    %c0_53 = arith.constant 0 : index
    %c0_54 = arith.constant 0 : index
    %c0_55 = arith.constant 0 : index
    %70 = vector.load %arg12[%c0_53, %c0_54, %c0_55] : memref<2x8x32xf32, #tpu.memory_space<vmem>>, vector<2x1x32xf32>
    %71 = vector.shape_cast %70 : vector<2x1x32xf32> to vector<2x32xf32>
    %72 = vector.shape_cast %69 : vector<2x32xf32> to vector<2x1x32xf32>
    tpu.vector_store %arg12[%c0_53, %c0_54, %c0_55], %72 {strides = array<i32>} : memref<2x8x32xf32, #tpu.memory_space<vmem>>, vector<2x1x32xf32>,
    %c0_56 = arith.constant 0 : index
    %c1_57 = arith.constant 1 : index
    %73 = memref.load %arg0[%c0_56, %c1_57] : memref<2x8xi32, #tpu.memory_space<smem>>
    %74 = arith.index_cast %73 : i32 to index
    %c0_58 = arith.constant 0 : index
    %75 = vector.load %arg14[%74, %c0_58] : memref<16x32xf32, #tpu.memory_space<vmem>>, vector<1x32xf32>
    %c1_59 = arith.constant 1 : index
    %c1_60 = arith.constant 1 : index
    %76 = memref.load %arg0[%c1_59, %c1_60] : memref<2x8xi32, #tpu.memory_space<smem>>
    %77 = arith.index_cast %76 : i32 to index
    %c0_61 = arith.constant 0 : index
    %78 = vector.load %arg14[%77, %c0_61] : memref<16x32xf32, #tpu.memory_space<vmem>>, vector<1x32xf32>
    %79 = tpu.concatenate %75, %78 in 0 : vector<1x32xf32>, vector<1x32xf32> -> vector<2x32xf32>
    %c0_62 = arith.constant 0 : index
    %c1_63 = arith.constant 1 : index
    %80 = memref.load %arg0[%c0_62, %c1_63] : memref<2x8xi32, #tpu.memory_space<smem>>
    %81 = arith.index_cast %80 : i32 to index
    %c0_64 = arith.constant 0 : index
    %82 = vector.load %arg15[%81, %c0_64] : memref<16x32xf32, #tpu.memory_space<vmem>>, vector<1x32xf32>
    %c1_65 = arith.constant 1 : index
    %c1_66 = arith.constant 1 : index
    %83 = memref.load %arg0[%c1_65, %c1_66] : memref<2x8xi32, #tpu.memory_space<smem>>
    %84 = arith.index_cast %83 : i32 to index
    %c0_67 = arith.constant 0 : index
    %85 = vector.load %arg15[%84, %c0_67] : memref<16x32xf32, #tpu.memory_space<vmem>>, vector<1x32xf32>
    %86 = tpu.concatenate %82, %85 in 0 : vector<1x32xf32>, vector<1x32xf32> -> vector<2x32xf32>
    %c0_68 = arith.constant 0 : index
    %c1_69 = arith.constant 1 : index
    %87 = memref.load %arg0[%c0_68, %c1_69] : memref<2x8xi32, #tpu.memory_space<smem>>
    %88 = arith.index_cast %87 : i32 to index
    %c0_70 = arith.constant 0 : index
    %89 = vector.load %arg16[%88, %c0_70] : memref<16x32xf32, #tpu.memory_space<vmem>>, vector<1x32xf32>
    %c1_71 = arith.constant 1 : index
    %c1_72 = arith.constant 1 : index
    %90 = memref.load %arg0[%c1_71, %c1_72] : memref<2x8xi32, #tpu.memory_space<smem>>
    %91 = arith.index_cast %90 : i32 to index
    %c0_73 = arith.constant 0 : index
    %92 = vector.load %arg16[%91, %c0_73] : memref<16x32xf32, #tpu.memory_space<vmem>>, vector<1x32xf32>
    %93 = tpu.concatenate %89, %92 in 0 : vector<1x32xf32>, vector<1x32xf32> -> vector<2x32xf32>
    %cst_74 = arith.constant dense<0.000000e+00> : vector<2x32xf32>
    %94 = tpu.matmul %69, %19, %cst_74 {dimension_numbers = #tpu.dot_dimension_numbers<[1], [0], [0], [1], [0, 0, 1, 1], [], []>} : vector<2x32xf32>, vector<32x32xf32>, vector<2x32xf32> -> vector<2x32xf32>
    %cst_75 = arith.constant dense<0.000000e+00> : vector<2x32xf32>
    %95 = tpu.matmul %69, %20, %cst_75 {dimension_numbers = #tpu.dot_dimension_numbers<[1], [0], [0], [1], [0, 0, 1, 1], [], []>} : vector<2x32xf32>, vector<32x32xf32>, vector<2x32xf32> -> vector<2x32xf32>
    %cst_76 = arith.constant dense<0.000000e+00> : vector<2x32xf32>
    %96 = tpu.matmul %69, %21, %cst_76 {dimension_numbers = #tpu.dot_dimension_numbers<[1], [0], [0], [1], [0, 0, 1, 1], [], []>} : vector<2x32xf32>, vector<32x32xf32>, vector<2x32xf32> -> vector<2x32xf32>
    %97 = arith.addf %79, %94 : vector<2x32xf32>
    %98 = arith.negf %97 : vector<2x32xf32>
    %99 = math.exp %98 : vector<2x32xf32>
    %cst_77 = arith.constant 1.000000e+00 : f32
    %100 = vector.broadcast %cst_77 : f32 to vector<2x32xf32>
    %101 = arith.addf %100, %99 : vector<2x32xf32>
    %102 = arith.divf %100, %101 : vector<2x32xf32>
    %103 = arith.addf %86, %95 : vector<2x32xf32>
    %104 = arith.negf %103 : vector<2x32xf32>
    %105 = math.exp %104 : vector<2x32xf32>
    %cst_78 = arith.constant 1.000000e+00 : f32
    %106 = vector.broadcast %cst_78 : f32 to vector<2x32xf32>
    %107 = arith.addf %106, %105 : vector<2x32xf32>
    %108 = arith.divf %106, %107 : vector<2x32xf32>
    %109 = vector.broadcast %22 : vector<1x32xf32> to vector<2x32xf32>
    %110 = arith.addf %96, %109 : vector<2x32xf32>
    %111 = arith.mulf %102, %110 : vector<2x32xf32>
    %112 = arith.addf %93, %111 : vector<2x32xf32>
    %113 = math.tanh %112 : vector<2x32xf32>
    %cst_79 = arith.constant 1.000000e+00 : f32
    %114 = vector.broadcast %cst_79 : f32 to vector<2x32xf32>
    %115 = arith.subf %114, %108 : vector<2x32xf32>
    %116 = arith.mulf %115, %113 : vector<2x32xf32>
    %117 = arith.mulf %108, %69 : vector<2x32xf32>
    %118 = arith.addf %116, %117 : vector<2x32xf32>
    %c0_80 = arith.constant 0 : index
    %c1_81 = arith.constant 1 : index
    %c0_82 = arith.constant 0 : index
    %119 = vector.load %arg12[%c0_80, %c1_81, %c0_82] : memref<2x8x32xf32, #tpu.memory_space<vmem>>, vector<2x1x32xf32>
    %120 = vector.shape_cast %119 : vector<2x1x32xf32> to vector<2x32xf32>
    %121 = vector.shape_cast %118 : vector<2x32xf32> to vector<2x1x32xf32>
    tpu.vector_store %arg12[%c0_80, %c1_81, %c0_82], %121 {strides = array<i32>} : memref<2x8x32xf32, #tpu.memory_space<vmem>>, vector<2x1x32xf32>,
    %c0_83 = arith.constant 0 : index
    %c2 = arith.constant 2 : index
    %122 = memref.load %arg0[%c0_83, %c2] : memref<2x8xi32, #tpu.memory_space<smem>>
    %123 = arith.index_cast %122 : i32 to index
    %c0_84 = arith.constant 0 : index
    %124 = vector.load %arg14[%123, %c0_84] : memref<16x32xf32, #tpu.memory_space<vmem>>, vector<1x32xf32>
    %c1_85 = arith.constant 1 : index
    %c2_86 = arith.constant 2 : index
    %125 = memref.load %arg0[%c1_85, %c2_86] : memref<2x8xi32, #tpu.memory_space<smem>>
    %126 = arith.index_cast %125 : i32 to index
    %c0_87 = arith.constant 0 : index
    %127 = vector.load %arg14[%126, %c0_87] : memref<16x32xf32, #tpu.memory_space<vmem>>, vector<1x32xf32>
    %128 = tpu.concatenate %124, %127 in 0 : vector<1x32xf32>, vector<1x32xf32> -> vector<2x32xf32>
    %c0_88 = arith.constant 0 : index
    %c2_89 = arith.constant 2 : index
    %129 = memref.load %arg0[%c0_88, %c2_89] : memref<2x8xi32, #tpu.memory_space<smem>>
    %130 = arith.index_cast %129 : i32 to index
    %c0_90 = arith.constant 0 : index
    %131 = vector.load %arg15[%130, %c0_90] : memref<16x32xf32, #tpu.memory_space<vmem>>, vector<1x32xf32>
    %c1_91 = arith.constant 1 : index
    %c2_92 = arith.constant 2 : index
    %132 = memref.load %arg0[%c1_91, %c2_92] : memref<2x8xi32, #tpu.memory_space<smem>>
    %133 = arith.index_cast %132 : i32 to index
    %c0_93 = arith.constant 0 : index
    %134 = vector.load %arg15[%133, %c0_93] : memref<16x32xf32, #tpu.memory_space<vmem>>, vector<1x32xf32>
    %135 = tpu.concatenate %131, %134 in 0 : vector<1x32xf32>, vector<1x32xf32> -> vector<2x32xf32>
    %c0_94 = arith.constant 0 : index
    %c2_95 = arith.constant 2 : index
    %136 = memref.load %arg0[%c0_94, %c2_95] : memref<2x8xi32, #tpu.memory_space<smem>>
    %137 = arith.index_cast %136 : i32 to index
    %c0_96 = arith.constant 0 : index
    %138 = vector.load %arg16[%137, %c0_96] : memref<16x32xf32, #tpu.memory_space<vmem>>, vector<1x32xf32>
    %c1_97 = arith.constant 1 : index
    %c2_98 = arith.constant 2 : index
    %139 = memref.load %arg0[%c1_97, %c2_98] : memref<2x8xi32, #tpu.memory_space<smem>>
    %140 = arith.index_cast %139 : i32 to index
    %c0_99 = arith.constant 0 : index
    %141 = vector.load %arg16[%140, %c0_99] : memref<16x32xf32, #tpu.memory_space<vmem>>, vector<1x32xf32>
    %142 = tpu.concatenate %138, %141 in 0 : vector<1x32xf32>, vector<1x32xf32> -> vector<2x32xf32>
    %cst_100 = arith.constant dense<0.000000e+00> : vector<2x32xf32>
    %143 = tpu.matmul %118, %19, %cst_100 {dimension_numbers = #tpu.dot_dimension_numbers<[1], [0], [0], [1], [0, 0, 1, 1], [], []>} : vector<2x32xf32>, vector<32x32xf32>, vector<2x32xf32> -> vector<2x32xf32>
    %cst_101 = arith.constant dense<0.000000e+00> : vector<2x32xf32>
    %144 = tpu.matmul %118, %20, %cst_101 {dimension_numbers = #tpu.dot_dimension_numbers<[1], [0], [0], [1], [0, 0, 1, 1], [], []>} : vector<2x32xf32>, vector<32x32xf32>, vector<2x32xf32> -> vector<2x32xf32>
    %cst_102 = arith.constant dense<0.000000e+00> : vector<2x32xf32>
    %145 = tpu.matmul %118, %21, %cst_102 {dimension_numbers = #tpu.dot_dimension_numbers<[1], [0], [0], [1], [0, 0, 1, 1], [], []>} : vector<2x32xf32>, vector<32x32xf32>, vector<2x32xf32> -> vector<2x32xf32>
    %146 = arith.addf %128, %143 : vector<2x32xf32>
    %147 = arith.negf %146 : vector<2x32xf32>
    %148 = math.exp %147 : vector<2x32xf32>
    %cst_103 = arith.constant 1.000000e+00 : f32
    %149 = vector.broadcast %cst_103 : f32 to vector<2x32xf32>
    %150 = arith.addf %149, %148 : vector<2x32xf32>
    %151 = arith.divf %149, %150 : vector<2x32xf32>
    %152 = arith.addf %135, %144 : vector<2x32xf32>
    %153 = arith.negf %152 : vector<2x32xf32>
    %154 = math.exp %153 : vector<2x32xf32>
    %cst_104 = arith.constant 1.000000e+00 : f32
    %155 = vector.broadcast %cst_104 : f32 to vector<2x32xf32>
    %156 = arith.addf %155, %154 : vector<2x32xf32>
    %157 = arith.divf %155, %156 : vector<2x32xf32>
    %158 = vector.broadcast %22 : vector<1x32xf32> to vector<2x32xf32>
    %159 = arith.addf %145, %158 : vector<2x32xf32>
    %160 = arith.mulf %151, %159 : vector<2x32xf32>
    %161 = arith.addf %142, %160 : vector<2x32xf32>
    %162 = math.tanh %161 : vector<2x32xf32>
    %cst_105 = arith.constant 1.000000e+00 : f32
    %163 = vector.broadcast %cst_105 : f32 to vector<2x32xf32>
    %164 = arith.subf %163, %157 : vector<2x32xf32>
    %165 = arith.mulf %164, %162 : vector<2x32xf32>
    %166 = arith.mulf %157, %118 : vector<2x32xf32>
    %167 = arith.addf %165, %166 : vector<2x32xf32>
    %c0_106 = arith.constant 0 : index
    %c2_107 = arith.constant 2 : index
    %c0_108 = arith.constant 0 : index
    %168 = vector.load %arg12[%c0_106, %c2_107, %c0_108] : memref<2x8x32xf32, #tpu.memory_space<vmem>>, vector<2x1x32xf32>
    %169 = vector.shape_cast %168 : vector<2x1x32xf32> to vector<2x32xf32>
    %170 = vector.shape_cast %167 : vector<2x32xf32> to vector<2x1x32xf32>
    tpu.vector_store %arg12[%c0_106, %c2_107, %c0_108], %170 {strides = array<i32>} : memref<2x8x32xf32, #tpu.memory_space<vmem>>, vector<2x1x32xf32>,
    %c0_109 = arith.constant 0 : index
    %c3 = arith.constant 3 : index
    %171 = memref.load %arg0[%c0_109, %c3] : memref<2x8xi32, #tpu.memory_space<smem>>
    %172 = arith.index_cast %171 : i32 to index
    %c0_110 = arith.constant 0 : index
    %173 = vector.load %arg14[%172, %c0_110] : memref<16x32xf32, #tpu.memory_space<vmem>>, vector<1x32xf32>
    %c1_111 = arith.constant 1 : index
    %c3_112 = arith.constant 3 : index
    %174 = memref.load %arg0[%c1_111, %c3_112] : memref<2x8xi32, #tpu.memory_space<smem>>
    %175 = arith.index_cast %174 : i32 to index
    %c0_113 = arith.constant 0 : index
    %176 = vector.load %arg14[%175, %c0_113] : memref<16x32xf32, #tpu.memory_space<vmem>>, vector<1x32xf32>
    %177 = tpu.concatenate %173, %176 in 0 : vector<1x32xf32>, vector<1x32xf32> -> vector<2x32xf32>
    %c0_114 = arith.constant 0 : index
    %c3_115 = arith.constant 3 : index
    %178 = memref.load %arg0[%c0_114, %c3_115] : memref<2x8xi32, #tpu.memory_space<smem>>
    %179 = arith.index_cast %178 : i32 to index
    %c0_116 = arith.constant 0 : index
    %180 = vector.load %arg15[%179, %c0_116] : memref<16x32xf32, #tpu.memory_space<vmem>>, vector<1x32xf32>
    %c1_117 = arith.constant 1 : index
    %c3_118 = arith.constant 3 : index
    %181 = memref.load %arg0[%c1_117, %c3_118] : memref<2x8xi32, #tpu.memory_space<smem>>
    %182 = arith.index_cast %181 : i32 to index
    %c0_119 = arith.constant 0 : index
    %183 = vector.load %arg15[%182, %c0_119] : memref<16x32xf32, #tpu.memory_space<vmem>>, vector<1x32xf32>
    %184 = tpu.concatenate %180, %183 in 0 : vector<1x32xf32>, vector<1x32xf32> -> vector<2x32xf32>
    %c0_120 = arith.constant 0 : index
    %c3_121 = arith.constant 3 : index
    %185 = memref.load %arg0[%c0_120, %c3_121] : memref<2x8xi32, #tpu.memory_space<smem>>
    %186 = arith.index_cast %185 : i32 to index
    %c0_122 = arith.constant 0 : index
    %187 = vector.load %arg16[%186, %c0_122] : memref<16x32xf32, #tpu.memory_space<vmem>>, vector<1x32xf32>
    %c1_123 = arith.constant 1 : index
    %c3_124 = arith.constant 3 : index
    %188 = memref.load %arg0[%c1_123, %c3_124] : memref<2x8xi32, #tpu.memory_space<smem>>
    %189 = arith.index_cast %188 : i32 to index
    %c0_125 = arith.constant 0 : index
    %190 = vector.load %arg16[%189, %c0_125] : memref<16x32xf32, #tpu.memory_space<vmem>>, vector<1x32xf32>
    %191 = tpu.concatenate %187, %190 in 0 : vector<1x32xf32>, vector<1x32xf32> -> vector<2x32xf32>
    %cst_126 = arith.constant dense<0.000000e+00> : vector<2x32xf32>
    %192 = tpu.matmul %167, %19, %cst_126 {dimension_numbers = #tpu.dot_dimension_numbers<[1], [0], [0], [1], [0, 0, 1, 1], [], []>} : vector<2x32xf32>, vector<32x32xf32>, vector<2x32xf32> -> vector<2x32xf32>
    %cst_127 = arith.constant dense<0.000000e+00> : vector<2x32xf32>
    %193 = tpu.matmul %167, %20, %cst_127 {dimension_numbers = #tpu.dot_dimension_numbers<[1], [0], [0], [1], [0, 0, 1, 1], [], []>} : vector<2x32xf32>, vector<32x32xf32>, vector<2x32xf32> -> vector<2x32xf32>
    %cst_128 = arith.constant dense<0.000000e+00> : vector<2x32xf32>
    %194 = tpu.matmul %167, %21, %cst_128 {dimension_numbers = #tpu.dot_dimension_numbers<[1], [0], [0], [1], [0, 0, 1, 1], [], []>} : vector<2x32xf32>, vector<32x32xf32>, vector<2x32xf32> -> vector<2x32xf32>
    %195 = arith.addf %177, %192 : vector<2x32xf32>
    %196 = arith.negf %195 : vector<2x32xf32>
    %197 = math.exp %196 : vector<2x32xf32>
    %cst_129 = arith.constant 1.000000e+00 : f32
    %198 = vector.broadcast %cst_129 : f32 to vector<2x32xf32>
    %199 = arith.addf %198, %197 : vector<2x32xf32>
    %200 = arith.divf %198, %199 : vector<2x32xf32>
    %201 = arith.addf %184, %193 : vector<2x32xf32>
    %202 = arith.negf %201 : vector<2x32xf32>
    %203 = math.exp %202 : vector<2x32xf32>
    %cst_130 = arith.constant 1.000000e+00 : f32
    %204 = vector.broadcast %cst_130 : f32 to vector<2x32xf32>
    %205 = arith.addf %204, %203 : vector<2x32xf32>
    %206 = arith.divf %204, %205 : vector<2x32xf32>
    %207 = vector.broadcast %22 : vector<1x32xf32> to vector<2x32xf32>
    %208 = arith.addf %194, %207 : vector<2x32xf32>
    %209 = arith.mulf %200, %208 : vector<2x32xf32>
    %210 = arith.addf %191, %209 : vector<2x32xf32>
    %211 = math.tanh %210 : vector<2x32xf32>
    %cst_131 = arith.constant 1.000000e+00 : f32
    %212 = vector.broadcast %cst_131 : f32 to vector<2x32xf32>
    %213 = arith.subf %212, %206 : vector<2x32xf32>
    %214 = arith.mulf %213, %211 : vector<2x32xf32>
    %215 = arith.mulf %206, %167 : vector<2x32xf32>
    %216 = arith.addf %214, %215 : vector<2x32xf32>
    %c0_132 = arith.constant 0 : index
    %c3_133 = arith.constant 3 : index
    %c0_134 = arith.constant 0 : index
    %217 = vector.load %arg12[%c0_132, %c3_133, %c0_134] : memref<2x8x32xf32, #tpu.memory_space<vmem>>, vector<2x1x32xf32>
    %218 = vector.shape_cast %217 : vector<2x1x32xf32> to vector<2x32xf32>
    %219 = vector.shape_cast %216 : vector<2x32xf32> to vector<2x1x32xf32>
    tpu.vector_store %arg12[%c0_132, %c3_133, %c0_134], %219 {strides = array<i32>} : memref<2x8x32xf32, #tpu.memory_space<vmem>>, vector<2x1x32xf32>,
    %c0_135 = arith.constant 0 : index
    %c4 = arith.constant 4 : index
    %220 = memref.load %arg0[%c0_135, %c4] : memref<2x8xi32, #tpu.memory_space<smem>>
    %221 = arith.index_cast %220 : i32 to index
    %c0_136 = arith.constant 0 : index
    %222 = vector.load %arg14[%221, %c0_136] : memref<16x32xf32, #tpu.memory_space<vmem>>, vector<1x32xf32>
    %c1_137 = arith.constant 1 : index
    %c4_138 = arith.constant 4 : index
    %223 = memref.load %arg0[%c1_137, %c4_138] : memref<2x8xi32, #tpu.memory_space<smem>>
    %224 = arith.index_cast %223 : i32 to index
    %c0_139 = arith.constant 0 : index
    %225 = vector.load %arg14[%224, %c0_139] : memref<16x32xf32, #tpu.memory_space<vmem>>, vector<1x32xf32>
    %226 = tpu.concatenate %222, %225 in 0 : vector<1x32xf32>, vector<1x32xf32> -> vector<2x32xf32>
    %c0_140 = arith.constant 0 : index
    %c4_141 = arith.constant 4 : index
    %227 = memref.load %arg0[%c0_140, %c4_141] : memref<2x8xi32, #tpu.memory_space<smem>>
    %228 = arith.index_cast %227 : i32 to index
    %c0_142 = arith.constant 0 : index
    %229 = vector.load %arg15[%228, %c0_142] : memref<16x32xf32, #tpu.memory_space<vmem>>, vector<1x32xf32>
    %c1_143 = arith.constant 1 : index
    %c4_144 = arith.constant 4 : index
    %230 = memref.load %arg0[%c1_143, %c4_144] : memref<2x8xi32, #tpu.memory_space<smem>>
    %231 = arith.index_cast %230 : i32 to index
    %c0_145 = arith.constant 0 : index
    %232 = vector.load %arg15[%231, %c0_145] : memref<16x32xf32, #tpu.memory_space<vmem>>, vector<1x32xf32>
    %233 = tpu.concatenate %229, %232 in 0 : vector<1x32xf32>, vector<1x32xf32> -> vector<2x32xf32>
    %c0_146 = arith.constant 0 : index
    %c4_147 = arith.constant 4 : index
    %234 = memref.load %arg0[%c0_146, %c4_147] : memref<2x8xi32, #tpu.memory_space<smem>>
    %235 = arith.index_cast %234 : i32 to index
    %c0_148 = arith.constant 0 : index
    %236 = vector.load %arg16[%235, %c0_148] : memref<16x32xf32, #tpu.memory_space<vmem>>, vector<1x32xf32>
    %c1_149 = arith.constant 1 : index
    %c4_150 = arith.constant 4 : index
    %237 = memref.load %arg0[%c1_149, %c4_150] : memref<2x8xi32, #tpu.memory_space<smem>>
    %238 = arith.index_cast %237 : i32 to index
    %c0_151 = arith.constant 0 : index
    %239 = vector.load %arg16[%238, %c0_151] : memref<16x32xf32, #tpu.memory_space<vmem>>, vector<1x32xf32>
    %240 = tpu.concatenate %236, %239 in 0 : vector<1x32xf32>, vector<1x32xf32> -> vector<2x32xf32>
    %cst_152 = arith.constant dense<0.000000e+00> : vector<2x32xf32>
    %241 = tpu.matmul %216, %19, %cst_152 {dimension_numbers = #tpu.dot_dimension_numbers<[1], [0], [0], [1], [0, 0, 1, 1], [], []>} : vector<2x32xf32>, vector<32x32xf32>, vector<2x32xf32> -> vector<2x32xf32>
    %cst_153 = arith.constant dense<0.000000e+00> : vector<2x32xf32>
    %242 = tpu.matmul %216, %20, %cst_153 {dimension_numbers = #tpu.dot_dimension_numbers<[1], [0], [0], [1], [0, 0, 1, 1], [], []>} : vector<2x32xf32>, vector<32x32xf32>, vector<2x32xf32> -> vector<2x32xf32>
    %cst_154 = arith.constant dense<0.000000e+00> : vector<2x32xf32>
    %243 = tpu.matmul %216, %21, %cst_154 {dimension_numbers = #tpu.dot_dimension_numbers<[1], [0], [0], [1], [0, 0, 1, 1], [], []>} : vector<2x32xf32>, vector<32x32xf32>, vector<2x32xf32> -> vector<2x32xf32>
    %244 = arith.addf %226, %241 : vector<2x32xf32>
    %245 = arith.negf %244 : vector<2x32xf32>
    %246 = math.exp %245 : vector<2x32xf32>
    %cst_155 = arith.constant 1.000000e+00 : f32
    %247 = vector.broadcast %cst_155 : f32 to vector<2x32xf32>
    %248 = arith.addf %247, %246 : vector<2x32xf32>
    %249 = arith.divf %247, %248 : vector<2x32xf32>
    %250 = arith.addf %233, %242 : vector<2x32xf32>
    %251 = arith.negf %250 : vector<2x32xf32>
    %252 = math.exp %251 : vector<2x32xf32>
    %cst_156 = arith.constant 1.000000e+00 : f32
    %253 = vector.broadcast %cst_156 : f32 to vector<2x32xf32>
    %254 = arith.addf %253, %252 : vector<2x32xf32>
    %255 = arith.divf %253, %254 : vector<2x32xf32>
    %256 = vector.broadcast %22 : vector<1x32xf32> to vector<2x32xf32>
    %257 = arith.addf %243, %256 : vector<2x32xf32>
    %258 = arith.mulf %249, %257 : vector<2x32xf32>
    %259 = arith.addf %240, %258 : vector<2x32xf32>
    %260 = math.tanh %259 : vector<2x32xf32>
    %cst_157 = arith.constant 1.000000e+00 : f32
    %261 = vector.broadcast %cst_157 : f32 to vector<2x32xf32>
    %262 = arith.subf %261, %255 : vector<2x32xf32>
    %263 = arith.mulf %262, %260 : vector<2x32xf32>
    %264 = arith.mulf %255, %216 : vector<2x32xf32>
    %265 = arith.addf %263, %264 : vector<2x32xf32>
    %c0_158 = arith.constant 0 : index
    %c4_159 = arith.constant 4 : index
    %c0_160 = arith.constant 0 : index
    %266 = vector.load %arg12[%c0_158, %c4_159, %c0_160] : memref<2x8x32xf32, #tpu.memory_space<vmem>>, vector<2x1x32xf32>
    %267 = vector.shape_cast %266 : vector<2x1x32xf32> to vector<2x32xf32>
    %268 = vector.shape_cast %265 : vector<2x32xf32> to vector<2x1x32xf32>
    tpu.vector_store %arg12[%c0_158, %c4_159, %c0_160], %268 {strides = array<i32>} : memref<2x8x32xf32, #tpu.memory_space<vmem>>, vector<2x1x32xf32>,
    %c0_161 = arith.constant 0 : index
    %c5 = arith.constant 5 : index
    %269 = memref.load %arg0[%c0_161, %c5] : memref<2x8xi32, #tpu.memory_space<smem>>
    %270 = arith.index_cast %269 : i32 to index
    %c0_162 = arith.constant 0 : index
    %271 = vector.load %arg14[%270, %c0_162] : memref<16x32xf32, #tpu.memory_space<vmem>>, vector<1x32xf32>
    %c1_163 = arith.constant 1 : index
    %c5_164 = arith.constant 5 : index
    %272 = memref.load %arg0[%c1_163, %c5_164] : memref<2x8xi32, #tpu.memory_space<smem>>
    %273 = arith.index_cast %272 : i32 to index
    %c0_165 = arith.constant 0 : index
    %274 = vector.load %arg14[%273, %c0_165] : memref<16x32xf32, #tpu.memory_space<vmem>>, vector<1x32xf32>
    %275 = tpu.concatenate %271, %274 in 0 : vector<1x32xf32>, vector<1x32xf32> -> vector<2x32xf32>
    %c0_166 = arith.constant 0 : index
    %c5_167 = arith.constant 5 : index
    %276 = memref.load %arg0[%c0_166, %c5_167] : memref<2x8xi32, #tpu.memory_space<smem>>
    %277 = arith.index_cast %276 : i32 to index
    %c0_168 = arith.constant 0 : index
    %278 = vector.load %arg15[%277, %c0_168] : memref<16x32xf32, #tpu.memory_space<vmem>>, vector<1x32xf32>
    %c1_169 = arith.constant 1 : index
    %c5_170 = arith.constant 5 : index
    %279 = memref.load %arg0[%c1_169, %c5_170] : memref<2x8xi32, #tpu.memory_space<smem>>
    %280 = arith.index_cast %279 : i32 to index
    %c0_171 = arith.constant 0 : index
    %281 = vector.load %arg15[%280, %c0_171] : memref<16x32xf32, #tpu.memory_space<vmem>>, vector<1x32xf32>
    %282 = tpu.concatenate %278, %281 in 0 : vector<1x32xf32>, vector<1x32xf32> -> vector<2x32xf32>
    %c0_172 = arith.constant 0 : index
    %c5_173 = arith.constant 5 : index
    %283 = memref.load %arg0[%c0_172, %c5_173] : memref<2x8xi32, #tpu.memory_space<smem>>
    %284 = arith.index_cast %283 : i32 to index
    %c0_174 = arith.constant 0 : index
    %285 = vector.load %arg16[%284, %c0_174] : memref<16x32xf32, #tpu.memory_space<vmem>>, vector<1x32xf32>
    %c1_175 = arith.constant 1 : index
    %c5_176 = arith.constant 5 : index
    %286 = memref.load %arg0[%c1_175, %c5_176] : memref<2x8xi32, #tpu.memory_space<smem>>
    %287 = arith.index_cast %286 : i32 to index
    %c0_177 = arith.constant 0 : index
    %288 = vector.load %arg16[%287, %c0_177] : memref<16x32xf32, #tpu.memory_space<vmem>>, vector<1x32xf32>
    %289 = tpu.concatenate %285, %288 in 0 : vector<1x32xf32>, vector<1x32xf32> -> vector<2x32xf32>
    %cst_178 = arith.constant dense<0.000000e+00> : vector<2x32xf32>
    %290 = tpu.matmul %265, %19, %cst_178 {dimension_numbers = #tpu.dot_dimension_numbers<[1], [0], [0], [1], [0, 0, 1, 1], [], []>} : vector<2x32xf32>, vector<32x32xf32>, vector<2x32xf32> -> vector<2x32xf32>
    %cst_179 = arith.constant dense<0.000000e+00> : vector<2x32xf32>
    %291 = tpu.matmul %265, %20, %cst_179 {dimension_numbers = #tpu.dot_dimension_numbers<[1], [0], [0], [1], [0, 0, 1, 1], [], []>} : vector<2x32xf32>, vector<32x32xf32>, vector<2x32xf32> -> vector<2x32xf32>
    %cst_180 = arith.constant dense<0.000000e+00> : vector<2x32xf32>
    %292 = tpu.matmul %265, %21, %cst_180 {dimension_numbers = #tpu.dot_dimension_numbers<[1], [0], [0], [1], [0, 0, 1, 1], [], []>} : vector<2x32xf32>, vector<32x32xf32>, vector<2x32xf32> -> vector<2x32xf32>
    %293 = arith.addf %275, %290 : vector<2x32xf32>
    %294 = arith.negf %293 : vector<2x32xf32>
    %295 = math.exp %294 : vector<2x32xf32>
    %cst_181 = arith.constant 1.000000e+00 : f32
    %296 = vector.broadcast %cst_181 : f32 to vector<2x32xf32>
    %297 = arith.addf %296, %295 : vector<2x32xf32>
    %298 = arith.divf %296, %297 : vector<2x32xf32>
    %299 = arith.addf %282, %291 : vector<2x32xf32>
    %300 = arith.negf %299 : vector<2x32xf32>
    %301 = math.exp %300 : vector<2x32xf32>
    %cst_182 = arith.constant 1.000000e+00 : f32
    %302 = vector.broadcast %cst_182 : f32 to vector<2x32xf32>
    %303 = arith.addf %302, %301 : vector<2x32xf32>
    %304 = arith.divf %302, %303 : vector<2x32xf32>
    %305 = vector.broadcast %22 : vector<1x32xf32> to vector<2x32xf32>
    %306 = arith.addf %292, %305 : vector<2x32xf32>
    %307 = arith.mulf %298, %306 : vector<2x32xf32>
    %308 = arith.addf %289, %307 : vector<2x32xf32>
    %309 = math.tanh %308 : vector<2x32xf32>
    %cst_183 = arith.constant 1.000000e+00 : f32
    %310 = vector.broadcast %cst_183 : f32 to vector<2x32xf32>
    %311 = arith.subf %310, %304 : vector<2x32xf32>
    %312 = arith.mulf %311, %309 : vector<2x32xf32>
    %313 = arith.mulf %304, %265 : vector<2x32xf32>
    %314 = arith.addf %312, %313 : vector<2x32xf32>
    %c0_184 = arith.constant 0 : index
    %c5_185 = arith.constant 5 : index
    %c0_186 = arith.constant 0 : index
    %315 = vector.load %arg12[%c0_184, %c5_185, %c0_186] : memref<2x8x32xf32, #tpu.memory_space<vmem>>, vector<2x1x32xf32>
    %316 = vector.shape_cast %315 : vector<2x1x32xf32> to vector<2x32xf32>
    %317 = vector.shape_cast %314 : vector<2x32xf32> to vector<2x1x32xf32>
    tpu.vector_store %arg12[%c0_184, %c5_185, %c0_186], %317 {strides = array<i32>} : memref<2x8x32xf32, #tpu.memory_space<vmem>>, vector<2x1x32xf32>,
    %c0_187 = arith.constant 0 : index
    %c6 = arith.constant 6 : index
    %318 = memref.load %arg0[%c0_187, %c6] : memref<2x8xi32, #tpu.memory_space<smem>>
    %319 = arith.index_cast %318 : i32 to index
    %c0_188 = arith.constant 0 : index
    %320 = vector.load %arg14[%319, %c0_188] : memref<16x32xf32, #tpu.memory_space<vmem>>, vector<1x32xf32>
    %c1_189 = arith.constant 1 : index
    %c6_190 = arith.constant 6 : index
    %321 = memref.load %arg0[%c1_189, %c6_190] : memref<2x8xi32, #tpu.memory_space<smem>>
    %322 = arith.index_cast %321 : i32 to index
    %c0_191 = arith.constant 0 : index
    %323 = vector.load %arg14[%322, %c0_191] : memref<16x32xf32, #tpu.memory_space<vmem>>, vector<1x32xf32>
    %324 = tpu.concatenate %320, %323 in 0 : vector<1x32xf32>, vector<1x32xf32> -> vector<2x32xf32>
    %c0_192 = arith.constant 0 : index
    %c6_193 = arith.constant 6 : index
    %325 = memref.load %arg0[%c0_192, %c6_193] : memref<2x8xi32, #tpu.memory_space<smem>>
    %326 = arith.index_cast %325 : i32 to index
    %c0_194 = arith.constant 0 : index
    %327 = vector.load %arg15[%326, %c0_194] : memref<16x32xf32, #tpu.memory_space<vmem>>, vector<1x32xf32>
    %c1_195 = arith.constant 1 : index
    %c6_196 = arith.constant 6 : index
    %328 = memref.load %arg0[%c1_195, %c6_196] : memref<2x8xi32, #tpu.memory_space<smem>>
    %329 = arith.index_cast %328 : i32 to index
    %c0_197 = arith.constant 0 : index
    %330 = vector.load %arg15[%329, %c0_197] : memref<16x32xf32, #tpu.memory_space<vmem>>, vector<1x32xf32>
    %331 = tpu.concatenate %327, %330 in 0 : vector<1x32xf32>, vector<1x32xf32> -> vector<2x32xf32>
    %c0_198 = arith.constant 0 : index
    %c6_199 = arith.constant 6 : index
    %332 = memref.load %arg0[%c0_198, %c6_199] : memref<2x8xi32, #tpu.memory_space<smem>>
    %333 = arith.index_cast %332 : i32 to index
    %c0_200 = arith.constant 0 : index
    %334 = vector.load %arg16[%333, %c0_200] : memref<16x32xf32, #tpu.memory_space<vmem>>, vector<1x32xf32>
    %c1_201 = arith.constant 1 : index
    %c6_202 = arith.constant 6 : index
    %335 = memref.load %arg0[%c1_201, %c6_202] : memref<2x8xi32, #tpu.memory_space<smem>>
    %336 = arith.index_cast %335 : i32 to index
    %c0_203 = arith.constant 0 : index
    %337 = vector.load %arg16[%336, %c0_203] : memref<16x32xf32, #tpu.memory_space<vmem>>, vector<1x32xf32>
    %338 = tpu.concatenate %334, %337 in 0 : vector<1x32xf32>, vector<1x32xf32> -> vector<2x32xf32>
    %cst_204 = arith.constant dense<0.000000e+00> : vector<2x32xf32>
    %339 = tpu.matmul %314, %19, %cst_204 {dimension_numbers = #tpu.dot_dimension_numbers<[1], [0], [0], [1], [0, 0, 1, 1], [], []>} : vector<2x32xf32>, vector<32x32xf32>, vector<2x32xf32> -> vector<2x32xf32>
    %cst_205 = arith.constant dense<0.000000e+00> : vector<2x32xf32>
    %340 = tpu.matmul %314, %20, %cst_205 {dimension_numbers = #tpu.dot_dimension_numbers<[1], [0], [0], [1], [0, 0, 1, 1], [], []>} : vector<2x32xf32>, vector<32x32xf32>, vector<2x32xf32> -> vector<2x32xf32>
    %cst_206 = arith.constant dense<0.000000e+00> : vector<2x32xf32>
    %341 = tpu.matmul %314, %21, %cst_206 {dimension_numbers = #tpu.dot_dimension_numbers<[1], [0], [0], [1], [0, 0, 1, 1], [], []>} : vector<2x32xf32>, vector<32x32xf32>, vector<2x32xf32> -> vector<2x32xf32>
    %342 = arith.addf %324, %339 : vector<2x32xf32>
    %343 = arith.negf %342 : vector<2x32xf32>
    %344 = math.exp %343 : vector<2x32xf32>
    %cst_207 = arith.constant 1.000000e+00 : f32
    %345 = vector.broadcast %cst_207 : f32 to vector<2x32xf32>
    %346 = arith.addf %345, %344 : vector<2x32xf32>
    %347 = arith.divf %345, %346 : vector<2x32xf32>
    %348 = arith.addf %331, %340 : vector<2x32xf32>
    %349 = arith.negf %348 : vector<2x32xf32>
    %350 = math.exp %349 : vector<2x32xf32>
    %cst_208 = arith.constant 1.000000e+00 : f32
    %351 = vector.broadcast %cst_208 : f32 to vector<2x32xf32>
    %352 = arith.addf %351, %350 : vector<2x32xf32>
    %353 = arith.divf %351, %352 : vector<2x32xf32>
    %354 = vector.broadcast %22 : vector<1x32xf32> to vector<2x32xf32>
    %355 = arith.addf %341, %354 : vector<2x32xf32>
    %356 = arith.mulf %347, %355 : vector<2x32xf32>
    %357 = arith.addf %338, %356 : vector<2x32xf32>
    %358 = math.tanh %357 : vector<2x32xf32>
    %cst_209 = arith.constant 1.000000e+00 : f32
    %359 = vector.broadcast %cst_209 : f32 to vector<2x32xf32>
    %360 = arith.subf %359, %353 : vector<2x32xf32>
    %361 = arith.mulf %360, %358 : vector<2x32xf32>
    %362 = arith.mulf %353, %314 : vector<2x32xf32>
    %363 = arith.addf %361, %362 : vector<2x32xf32>
    %c0_210 = arith.constant 0 : index
    %c6_211 = arith.constant 6 : index
    %c0_212 = arith.constant 0 : index
    %364 = vector.load %arg12[%c0_210, %c6_211, %c0_212] : memref<2x8x32xf32, #tpu.memory_space<vmem>>, vector<2x1x32xf32>
    %365 = vector.shape_cast %364 : vector<2x1x32xf32> to vector<2x32xf32>
    %366 = vector.shape_cast %363 : vector<2x32xf32> to vector<2x1x32xf32>
    tpu.vector_store %arg12[%c0_210, %c6_211, %c0_212], %366 {strides = array<i32>} : memref<2x8x32xf32, #tpu.memory_space<vmem>>, vector<2x1x32xf32>,
    %c0_213 = arith.constant 0 : index
    %c7 = arith.constant 7 : index
    %367 = memref.load %arg0[%c0_213, %c7] : memref<2x8xi32, #tpu.memory_space<smem>>
    %368 = arith.index_cast %367 : i32 to index
    %c0_214 = arith.constant 0 : index
    %369 = vector.load %arg14[%368, %c0_214] : memref<16x32xf32, #tpu.memory_space<vmem>>, vector<1x32xf32>
    %c1_215 = arith.constant 1 : index
    %c7_216 = arith.constant 7 : index
    %370 = memref.load %arg0[%c1_215, %c7_216] : memref<2x8xi32, #tpu.memory_space<smem>>
    %371 = arith.index_cast %370 : i32 to index
    %c0_217 = arith.constant 0 : index
    %372 = vector.load %arg14[%371, %c0_217] : memref<16x32xf32, #tpu.memory_space<vmem>>, vector<1x32xf32>
    %373 = tpu.concatenate %369, %372 in 0 : vector<1x32xf32>, vector<1x32xf32> -> vector<2x32xf32>
    %c0_218 = arith.constant 0 : index
    %c7_219 = arith.constant 7 : index
    %374 = memref.load %arg0[%c0_218, %c7_219] : memref<2x8xi32, #tpu.memory_space<smem>>
    %375 = arith.index_cast %374 : i32 to index
    %c0_220 = arith.constant 0 : index
    %376 = vector.load %arg15[%375, %c0_220] : memref<16x32xf32, #tpu.memory_space<vmem>>, vector<1x32xf32>
    %c1_221 = arith.constant 1 : index
    %c7_222 = arith.constant 7 : index
    %377 = memref.load %arg0[%c1_221, %c7_222] : memref<2x8xi32, #tpu.memory_space<smem>>
    %378 = arith.index_cast %377 : i32 to index
    %c0_223 = arith.constant 0 : index
    %379 = vector.load %arg15[%378, %c0_223] : memref<16x32xf32, #tpu.memory_space<vmem>>, vector<1x32xf32>
    %380 = tpu.concatenate %376, %379 in 0 : vector<1x32xf32>, vector<1x32xf32> -> vector<2x32xf32>
    %c0_224 = arith.constant 0 : index
    %c7_225 = arith.constant 7 : index
    %381 = memref.load %arg0[%c0_224, %c7_225] : memref<2x8xi32, #tpu.memory_space<smem>>
    %382 = arith.index_cast %381 : i32 to index
    %c0_226 = arith.constant 0 : index
    %383 = vector.load %arg16[%382, %c0_226] : memref<16x32xf32, #tpu.memory_space<vmem>>, vector<1x32xf32>
    %c1_227 = arith.constant 1 : index
    %c7_228 = arith.constant 7 : index
    %384 = memref.load %arg0[%c1_227, %c7_228] : memref<2x8xi32, #tpu.memory_space<smem>>
    %385 = arith.index_cast %384 : i32 to index
    %c0_229 = arith.constant 0 : index
    %386 = vector.load %arg16[%385, %c0_229] : memref<16x32xf32, #tpu.memory_space<vmem>>, vector<1x32xf32>
    %387 = tpu.concatenate %383, %386 in 0 : vector<1x32xf32>, vector<1x32xf32> -> vector<2x32xf32>
    %cst_230 = arith.constant dense<0.000000e+00> : vector<2x32xf32>
    %388 = tpu.matmul %363, %19, %cst_230 {dimension_numbers = #tpu.dot_dimension_numbers<[1], [0], [0], [1], [0, 0, 1, 1], [], []>} : vector<2x32xf32>, vector<32x32xf32>, vector<2x32xf32> -> vector<2x32xf32>
    %cst_231 = arith.constant dense<0.000000e+00> : vector<2x32xf32>
    %389 = tpu.matmul %363, %20, %cst_231 {dimension_numbers = #tpu.dot_dimension_numbers<[1], [0], [0], [1], [0, 0, 1, 1], [], []>} : vector<2x32xf32>, vector<32x32xf32>, vector<2x32xf32> -> vector<2x32xf32>
    %cst_232 = arith.constant dense<0.000000e+00> : vector<2x32xf32>
    %390 = tpu.matmul %363, %21, %cst_232 {dimension_numbers = #tpu.dot_dimension_numbers<[1], [0], [0], [1], [0, 0, 1, 1], [], []>} : vector<2x32xf32>, vector<32x32xf32>, vector<2x32xf32> -> vector<2x32xf32>
    %391 = arith.addf %373, %388 : vector<2x32xf32>
    %392 = arith.negf %391 : vector<2x32xf32>
    %393 = math.exp %392 : vector<2x32xf32>
    %cst_233 = arith.constant 1.000000e+00 : f32
    %394 = vector.broadcast %cst_233 : f32 to vector<2x32xf32>
    %395 = arith.addf %394, %393 : vector<2x32xf32>
    %396 = arith.divf %394, %395 : vector<2x32xf32>
    %397 = arith.addf %380, %389 : vector<2x32xf32>
    %398 = arith.negf %397 : vector<2x32xf32>
    %399 = math.exp %398 : vector<2x32xf32>
    %cst_234 = arith.constant 1.000000e+00 : f32
    %400 = vector.broadcast %cst_234 : f32 to vector<2x32xf32>
    %401 = arith.addf %400, %399 : vector<2x32xf32>
    %402 = arith.divf %400, %401 : vector<2x32xf32>
    %403 = vector.broadcast %22 : vector<1x32xf32> to vector<2x32xf32>
    %404 = arith.addf %390, %403 : vector<2x32xf32>
    %405 = arith.mulf %396, %404 : vector<2x32xf32>
    %406 = arith.addf %387, %405 : vector<2x32xf32>
    %407 = math.tanh %406 : vector<2x32xf32>
    %cst_235 = arith.constant 1.000000e+00 : f32
    %408 = vector.broadcast %cst_235 : f32 to vector<2x32xf32>
    %409 = arith.subf %408, %402 : vector<2x32xf32>
    %410 = arith.mulf %409, %407 : vector<2x32xf32>
    %411 = arith.mulf %402, %363 : vector<2x32xf32>
    %412 = arith.addf %410, %411 : vector<2x32xf32>
    %c0_236 = arith.constant 0 : index
    %c7_237 = arith.constant 7 : index
    %c0_238 = arith.constant 0 : index
    %413 = vector.load %arg12[%c0_236, %c7_237, %c0_238] : memref<2x8x32xf32, #tpu.memory_space<vmem>>, vector<2x1x32xf32>
    %414 = vector.shape_cast %413 : vector<2x1x32xf32> to vector<2x32xf32>
    %415 = vector.shape_cast %412 : vector<2x32xf32> to vector<2x1x32xf32>
    tpu.vector_store %arg12[%c0_236, %c7_237, %c0_238], %415 {strides = array<i32>} : memref<2x8x32xf32, #tpu.memory_space<vmem>>, vector<2x1x32xf32>,
    %c0_239 = arith.constant 0 : index
    %c0_240 = arith.constant 0 : index
    %c0_241 = arith.constant 0 : index
    %416 = vector.load %arg13[%c0_239, %c0_240, %c0_241] : memref<1x2x32xf32, #tpu.memory_space<vmem>>, vector<1x2x32xf32>
    %417 = vector.shape_cast %416 : vector<1x2x32xf32> to vector<2x32xf32>
    %418 = vector.shape_cast %412 : vector<2x32xf32> to vector<1x2x32xf32>
    tpu.vector_store %arg13[%c0_239, %c0_240, %c0_241], %418 {strides = array<i32>} : memref<1x2x32xf32, #tpu.memory_space<vmem>>, vector<1x2x32xf32>,
    return
  }
}

</mosaic_0001>

<bundles_post_ra>
// kernel: tpu_custom_call.1
= control target key start
LH: loop header
LB: loop body
LE: loop exit
PB: predicated region body
PF: predicated region fallthrough
CT: control target
= control target key end

     0   :  { %19 = vsyncpa [#allocation8], 0  ;;  %s4500_s0 = inlined_call_operand.hbm [shape: s32[2,8], index: 0, kind: input, shape index: {}]   ;;  %s4501_s1 = inlined_call_operand.hbm [shape: f32[16,32], index: 1, kind: input, shape index: {}]   ;;  %s4502_s2 = inlined_call_operand.hbm [shape: f32[32,32], index: 2, kind: input, shape index: {}]   ;;  %s4503_s3 = inlined_call_operand.hbm [shape: f32[32,32], index: 3, kind: input, shape index: {}]   ;;  %s4504_s4 = inlined_call_operand.hbm [shape: f32[32,32], index: 4, kind: input, shape index: {}]   ;;  %s4505_s5 = inlined_call_operand.vmem [shape: f32[1,32], index: 5, kind: input, shape index: {}]   ;;  %s4506_s6 = inlined_call_operand.vmem [shape: f32[1,32], index: 6, kind: input, shape index: {}]   ;;  %s4507_s7 = inlined_call_operand.hbm [shape: f32[1,32], index: 7, kind: input, shape index: {}]   ;;  %s4508_s8 = inlined_call_operand.hbm [shape: f32[1,32], index: 8, kind: input, shape index: {}]   ;;  %s4509_s9 = inlined_call_operand.vmem [shape: f32[32,32], index: 9, kind: input, shape index: {}]   ;;  %s4510_s10 = inlined_call_operand.hbm [shape: f32[32,32], index: 10, kind: input, shape index: {}]   ;;  %s4511_s11 = inlined_call_operand.hbm [shape: f32[32,32], index: 11, kind: input, shape index: {}]   ;;  %s4512_s12 = inlined_call_operand.hbm [shape: f32[2,8,32], index: 12, kind: output, shape index: {0}]   ;;  %s4513_s13 = inlined_call_operand.hbm [shape: f32[1,2,32], index: 13, kind: output, shape index: {1}]  }
   0x1   :  { %20 = vsyncpa [#allocation6], 0 }
   0x2   :  { %21 = vsyncpa [#allocation11], 0 }
   0x3   :  { %22 = vsyncpa [#allocation14], 0 }
   0x4   :  { %23 = vsyncpa [#allocation17], 0 }
   0x5   :  { %24 = vsyncpa [#allocation20], 0 }
   0x6   :  { %25 = vsyncpa [#allocation7], 0 }
   0x7   :  { %26 = vsyncpa [#allocation23], 0  ;;  %s3839_s25 = smov [#allocation10]   ;;  %s3840_s27 = smov [#allocation13]  }
   0x8   :  { %s52_s26 = sshll.u32 %s3839_s25, 4  ;;  %s76_s28 = sshll.u32 %s3840_s27, 4  ;;  %s53_s26 = int_to_ptr.vmem [resolvable:$true] %s52_s26  ;;  %s3926_s28 = int_to_ptr.vmem [resolvable:$true] %s76_s28 }
   0x9   :  { %s3593_s14 = scalar_lea.hbm %s4502_s2, 512 }
   0xa   :  { %p3594_p0 = scmp.ne.s32.totalorder %s4502_s2, %s3593_s14  ;;  %p3597_p1 = scmp.lt.u32.totalorder %s3593_s14, %s4502_s2 }
   0xc   :  { %p3599_p2 = pnand %p3597_p1, %p3594_p0 }
   0xe   :  { %3602 = shalt.err (!%p3599_p2)
}
   0xf   :  { %s3603_s19 = scalar_lea.vmem %s53_s26, 512  ;;  %p3608_p4 = scmp.lt.s32.totalorder %s53_s26, %s53_s26 }
  0x10   :  { %p3604_p3 = scmp.ne.s32.totalorder %s53_s26, %s3603_s19  ;;  %p3609_p5 = scmp.lt.s32.totalorder %s3603_s19, %s3603_s19 }
  0x12   :  { %p3610_p6 = por %p3609_p5, %p3608_p4 }
  0x14   :  { %p3611_p7 = pnand %p3610_p6, %p3604_p3 }
  0x16   :  { %3614 = shalt.err (!%p3611_p7)
}
  0x17   :  { %s3841_s20 = smov 128   ;;  %s3842_s21 = smov 8  }
  0x18   :  { %58 = dma.hbm_to_vmem [thread:$0]  %s4502_s2, 512, %s53_s26, [#allocation11], %s3841_s20, %s3841_s20, %s3842_s21  }
  0x19   :  { %s3615_s27 = scalar_lea.hbm %s4504_s4, 512 }
  0x1a   :  { %p3616_p8 = scmp.ne.s32.totalorder %s4504_s4, %s3615_s27  ;;  %p3619_p9 = scmp.lt.u32.totalorder %s3615_s27, %s4504_s4 }
  0x1c   :  { %p3621_p10 = pnand %p3619_p9, %p3616_p8 }
  0x1e   :  { %3624 = shalt.err (!%p3621_p10)
}
  0x1f   :  { %s3625_s16 = scalar_lea.vmem %s3926_s28, 512  ;;  %p3630_p12 = scmp.lt.s32.totalorder %s3926_s28, %s3926_s28 }
  0x20   :  { %p3626_p11 = scmp.ne.s32.totalorder %s3926_s28, %s3625_s16  ;;  %p3631_p13 = scmp.lt.s32.totalorder %s3625_s16, %s3625_s16 }
  0x22   :  { %p3632_p0 = por %p3631_p13, %p3630_p12 }
  0x24   :  { %p3633_p1 = pnand %p3632_p0, %p3626_p11 }
  0x26   :  { %3636 = shalt.err (!%p3633_p1)
}
  0x27   :  { %82 = dma.hbm_to_vmem [thread:$0]  %s4504_s4, 512, %s3926_s28, [#allocation14], %s3841_s20, %s3841_s20, %s3842_s21  }
  0x28   :  { %s3843_s17 = smov [#allocation16]   ;;  %s3844_s19 = smov [#allocation9]  }
  0x29   :  { %s103_s18 = sshll.u32 %s3843_s17, 4  ;;  %s40_s22 = sshll.u32 %s3844_s19, 4  ;;  %s104_s18 = int_to_ptr.vmem [resolvable:$true] %s103_s18  ;;  %s41_s22 = int_to_ptr.vmem [resolvable:$true] %s40_s22 }
  0x2a   :  { %s3637_s25 = scalar_lea.hbm %s4508_s8, 16 }
  0x2b   :  { %p3638_p2 = scmp.ne.s32.totalorder %s4508_s8, %s3637_s25  ;;  %p3641_p3 = scmp.lt.u32.totalorder %s3637_s25, %s4508_s8 }
  0x2d   :  { %p3643_p4 = pnand %p3641_p3, %p3638_p2 }
  0x2f   :  { %3646 = shalt.err (!%p3643_p4)
}
  0x30   :  { %s3647_s4 = scalar_lea.vmem %s104_s18, 16  ;;  %s3651_s28 = scalar_lea.vmem %s104_s18, 32 }
  0x31   :  { %p3648_p5 = scmp.ne.s32.totalorder %s104_s18, %s3647_s4  ;;  %p3652_p6 = scmp.lt.s32.totalorder %s104_s18, %s104_s18 }
  0x32   :  { %p3653_p7 = scmp.lt.s32.totalorder %s3651_s28, %s3647_s4 }
  0x34   :  { %p3654_p8 = por %p3653_p7, %p3652_p6 }
  0x36   :  { %p3655_p9 = pnand %p3654_p8, %p3648_p5 }
  0x38   :  { %3658 = shalt.err (!%p3655_p9)
}
  0x39   :  { %106 = dma.hbm_to_vmem [thread:$0]  %s4508_s8, 16, %s104_s18, [#allocation17]  }
  0x3a   :  { %s3659_s17 = scalar_lea.hbm %s4500_s0, 32 }
  0x3b   :  { %p3660_p10 = scmp.ne.s32.totalorder %s4500_s0, %s3659_s17  ;;  %p3663_p11 = scmp.lt.u32.totalorder %s3659_s17, %s4500_s0 }
  0x3d   :  { %p3665_p12 = pnand %p3663_p11, %p3660_p10 }
  0x3f   :  { %3668 = shalt.err (!%p3665_p12)
}
  0x40   :  { %s3845_s27 = smov [#allocation5]   ;;  %s3669_s14 = scalar_lea.hbm %s4501_s1, 256 }
  0x41   :  { %34 = dma.hbm_to_smem %s4500_s0, 32, %s3845_s27, [#allocation8]  }
  0x42   :  { %p3670_p13 = scmp.ne.s32.totalorder %s4501_s1, %s3669_s14  ;;  %p3673_p0 = scmp.lt.u32.totalorder %s3669_s14, %s4501_s1 }
  0x44   :  { %p3675_p1 = pnand %p3673_p0, %p3670_p13 }
  0x46   :  { %3678 = shalt.err (!%p3675_p1)
}
  0x47   :  { %s3679_s2 = scalar_lea.vmem %s41_s22, 256  ;;  %p3684_p3 = scmp.lt.s32.totalorder %s41_s22, %s41_s22 }
  0x48   :  { %p3680_p2 = scmp.ne.s32.totalorder %s41_s22, %s3679_s2  ;;  %p3685_p4 = scmp.lt.s32.totalorder %s3679_s2, %s3679_s2 }
  0x4a   :  { %p3686_p5 = por %p3685_p4, %p3684_p3 }
  0x4c   :  { %p3687_p6 = pnand %p3686_p5, %p3680_p2 }
  0x4e   :  { %3690 = shalt.err (!%p3687_p6)
}
  0x4f   :  { %46 = dma.hbm_to_vmem [thread:$0]  %s4501_s1, 256, %s41_s22, [#allocation6], %s3841_s20, %s3841_s20, %s3842_s21  }
  0x50   :  { %s3846_s17 = smov [#allocation12]   ;;  %s3847_s23 = smov [#allocation15]  }
  0x51   :  { %s64_s19 = sshll.u32 %s3846_s17, 4  ;;  %s93_s24 = sshll.u32 %s3847_s23, 4  ;;  %s65_s19 = int_to_ptr.vmem [resolvable:$true] %s64_s19  ;;  %s94_s24 = int_to_ptr.vmem [resolvable:$true] %s93_s24 }
  0x52   :  { %s3691_s29 = scalar_lea.hbm %s4503_s3, 512 }
  0x53   :  { %p3692_p7 = scmp.ne.s32.totalorder %s4503_s3, %s3691_s29  ;;  %p3695_p8 = scmp.lt.u32.totalorder %s3691_s29, %s4503_s3 }
  0x55   :  { %p3697_p9 = pnand %p3695_p8, %p3692_p7 }
  0x57   :  { %3700 = shalt.err (!%p3697_p9)
}
  0x58   :  { %s3701_s1 = scalar_lea.vmem %s65_s19, 512  ;;  %p3706_p11 = scmp.lt.s32.totalorder %s65_s19, %s65_s19 }
  0x59   :  { %p3702_p10 = scmp.ne.s32.totalorder %s65_s19, %s3701_s1  ;;  %p3707_p12 = scmp.lt.s32.totalorder %s3701_s1, %s3701_s1 }
  0x5b   :  { %p3708_p13 = por %p3707_p12, %p3706_p11 }
  0x5d   :  { %p3709_p0 = pnand %p3708_p13, %p3702_p10 }
  0x5f   :  { %3712 = shalt.err (!%p3709_p0)
}
  0x60   :  { %70 = dma.hbm_to_vmem [thread:$0]  %s4503_s3, 512, %s65_s19, [#allocation11], %s3841_s20, %s3841_s20, %s3842_s21  }
  0x61   :  { %s3713_s16 = scalar_lea.hbm %s4507_s7, 16 }
  0x62   :  { %p3714_p1 = scmp.ne.s32.totalorder %s4507_s7, %s3713_s16  ;;  %p3717_p2 = scmp.lt.u32.totalorder %s3713_s16, %s4507_s7 }
  0x64   :  { %p3719_p3 = pnand %p3717_p2, %p3714_p1 }
  0x66   :  { %3722 = shalt.err (!%p3719_p3)
}
  0x67   :  { %s3723_s23 = scalar_lea.vmem %s94_s24, 16  ;;  %s3727_s25 = scalar_lea.vmem %s94_s24, 32 }
  0x68   :  { %p3724_p4 = scmp.ne.s32.totalorder %s94_s24, %s3723_s23  ;;  %p3728_p5 = scmp.lt.s32.totalorder %s94_s24, %s94_s24 }
  0x69   :  { %p3729_p6 = scmp.lt.s32.totalorder %s3727_s25, %s3723_s23 }
  0x6b   :  { %p3730_p7 = por %p3729_p6, %p3728_p5 }
  0x6d   :  { %p3731_p8 = pnand %p3730_p7, %p3724_p4 }
  0x6f   :  { %3734 = shalt.err (!%p3731_p8)
}
  0x70   :  { %96 = dma.hbm_to_vmem [thread:$0]  %s4507_s7, 16, %s94_s24, [#allocation14]  }
  0x71   :  { %s3848_s27 = smov [#allocation18]   ;;  %s3849_s30 = smov [#allocation19]  }
  0x72   :  { %s114_s29 = sshll.u32 %s3848_s27, 4  ;;  %s126_s8 = sshll.u32 %s3849_s30, 4  ;;  %s115_s29 = int_to_ptr.vmem [resolvable:$true] %s114_s29  ;;  %s127_s8 = int_to_ptr.vmem [resolvable:$true] %s126_s8 }
  0x73   :  { %s3735_s1 = scalar_lea.hbm %s4510_s10, 512 }
  0x74   :  { %p3736_p9 = scmp.ne.s32.totalorder %s4510_s10, %s3735_s1  ;;  %p3739_p10 = scmp.lt.u32.totalorder %s3735_s1, %s4510_s10 }
  0x76   :  { %p3741_p11 = pnand %p3739_p10, %p3736_p9 }
  0x78   :  { %3744 = shalt.err (!%p3741_p11)
}
  0x79   :  { %s3745_s7 = scalar_lea.vmem %s115_s29, 512  ;;  %p3750_p13 = scmp.lt.s32.totalorder %s115_s29, %s115_s29 }
  0x7a   :  { %p3746_p12 = scmp.ne.s32.totalorder %s115_s29, %s3745_s7  ;;  %p3751_p0 = scmp.lt.s32.totalorder %s3745_s7, %s3745_s7 }
  0x7c   :  { %p3752_p1 = por %p3751_p0, %p3750_p13 }
  0x7e   :  { %p3753_p2 = pnand %p3752_p1, %p3746_p12 }
  0x80   :  { %3756 = shalt.err (!%p3753_p2)
}
  0x81   :  { %120 = dma.hbm_to_vmem [thread:$0]  %s4510_s10, 512, %s115_s29, [#allocation17], %s3841_s20, %s3841_s20, %s3842_s21  }
  0x82   :  { %s3757_s26 = scalar_lea.hbm %s4511_s11, 512 }
  0x83   :  { %p3758_p3 = scmp.ne.s32.totalorder %s4511_s11, %s3757_s26  ;;  %p3761_p4 = scmp.lt.u32.totalorder %s3757_s26, %s4511_s11 }
  0x85   :  { %p3763_p5 = pnand %p3761_p4, %p3758_p3 }
  0x87   :  { %3766 = shalt.err (!%p3763_p5)
}
  0x88   :  { %s3767_s19 = scalar_lea.vmem %s127_s8, 512  ;;  %p3772_p7 = scmp.lt.s32.totalorder %s127_s8, %s127_s8 }
  0x89   :  { %p3768_p6 = scmp.ne.s32.totalorder %s127_s8, %s3767_s19  ;;  %p3773_p8 = scmp.lt.s32.totalorder %s3767_s19, %s3767_s19 }
  0x8b   :  { %p3774_p9 = por %p3773_p8, %p3772_p7 }
  0x8d   :  { %p3775_p10 = pnand %p3774_p9, %p3768_p6 }
  0x8f   :  { %3778 = shalt.err (!%p3775_p10)
}
  0x90   :  { %132 = dma.hbm_to_vmem [thread:$0]  %s4511_s11, 512, %s127_s8, [#allocation20], %s3841_s20, %s3841_s20, %s3842_s21  }
  0x91   :  { %3823 = dma.done.wait [#allocation8], 32  }
  0x92   :  { %3824 = vsyncadd [#allocation8], 4294967264 }
  0x93   :  { %3825 = dma.done.wait [#allocation6], 256  }
  0x94   :  { %3826 = vsyncadd [#allocation6], 4294967040 }
  0x95   :  { %3827 = dma.done.wait [#allocation11], 1024  }
  0x96   :  { %3828 = vsyncadd [#allocation11], 4294966272 }
  0x97   :  { %3829 = dma.done.wait [#allocation14], 528  }
  0x98   :  { %3830 = vsyncadd [#allocation14], 4294966768 }
  0x99   :  { %3831 = dma.done.wait [#allocation17], 528  }
  0x9a   :  { %3832 = vsyncadd [#allocation17], 4294966768 }
  0x9b   :  { %3833 = dma.done.wait [#allocation20], 512  }
  0x9c   :  { %3834 = vsyncadd [#allocation20], 4294966784 }
  0x9d   :  { %160 = sfence }
  0x9e   :  { %v163_v0 = vld [vmem:[#allocation10] sm:$0xff]  ;;  %v164_v1 = vld [vmem:[#allocation10 + $0x8] sm:$0xff]  ;;  %v165_v2 = vld [vmem:[#allocation10 + $0x10] sm:$0xff]  ;;  %vm174_vm0 = vcmask 261120   ;;  %v3850_v23 = vmov 0.0|0.0   ;;  %vm3851_vm1 = vmmov 0  }
  0x9f   :  { %v3327_v3 = vpack.c.bf16 %v164_v1, %v163_v0  ;;  %v166_v4 = vld [vmem:[#allocation10 + $0x18] sm:$0xff]  ;;  %v258_v5 = vld [vmem:[#allocation12] sm:$0xff]  ;;  %v259_v6 = vld [vmem:[#allocation12 + $0x8] sm:$0xff]  ;;  %v3852_v29 = vmov 0.0   ;;  %s4130_s7 = sld [smem:[#allocation5 + $0x80]]  ;;  %vm456_vm2 = vcmask 1040384  }
  0xa0   :  { %v3331_v7 = vpack.c.bf16 %v166_v4, %v165_v2  ;;  %v3335_v8 = vpack.c.bf16 %v259_v6, %v258_v5  ;;  %v161_v9 = vld [vmem:[#allocation9] sm:$0xff]  ;;  %v261_v11 = vld [vmem:[#allocation12 + $0x18] sm:$0xff]  ;;  %v346_v12 = vld [vmem:[#allocation13] sm:$0xff]  ;;  %s4132_s24 = sld [smem:[#allocation5]]  ;;  %vm739_vm3 = vcmask 253952   ;;  %s4186_s17 = sld [smem:[#allocation5 + $0x81]] }
  0xa1   :  { %v260_v10 = vld [vmem:[#allocation12 + $0x10] sm:$0xff]  ;;  %3328 = vmatprep.subr.bf16.mxu0 %v3327_v3  ;;  %3038 = vmatprep.mubr.msk.f32.mxu0 %vm174_vm0, %v161_v9  ;;  %v347_v13 = vld [vmem:[#allocation13 + $0x8] sm:$0xff]  ;;  %v349_v17 = vld [vmem:[#allocation13 + $0x18] sm:$0xff]  ;;  %s4188_s23 = sld [smem:[#allocation5 + $0x1]]  ;;  %s4233_s29 = sld [smem:[#allocation5 + $0x82]]  ;;  %vm2744_vm4 = vcmask 254976  }
  0xa2   :  { %3330 = vmatpush3.bf16.msra.mxu0 %v3327_v3  ;;  %3336 = vmatprep.subr.bf16.mxu1 %v3335_v8  ;;  %v3339_v14 = vpack.c.bf16 %v261_v11, %v260_v10  ;;  %v3343_v15 = vpack.c.bf16 %v347_v13, %v346_v12  ;;  %v348_v16 = vld [vmem:[#allocation13 + $0x10] sm:$0xff]  ;;  %v434_v18 = vld [vmem:[%s4509_s9] sm:$0xff]  ;;  %v435_v19 = vld [vmem:[%s4509_s9 + $0x8] sm:$0xff]  ;;  %s4235_s30 = sld [smem:[#allocation5 + $0x2]]  ;;  %s4280_s4 = sld [smem:[#allocation5 + $0x83]] }
  0xa3   :  { %3332 = vmatprep.subr.bf16.mxu0 %v3331_v7  ;;  %3338 = vmatpush3.bf16.msra.mxu1 %v3335_v8  ;;  %v162_v20 = vld [vmem:[#allocation9 + $0x8] sm:$0xff]  ;;  %v3347_v21 = vpack.c.bf16 %v349_v17, %v348_v16  ;;  %v4067_v22 = vpack.c.bf16 %v435_v19, %v434_v18  ;;  %v436_v24 = vld [vmem:[%s4509_s9 + $0x10] sm:$0xff]  ;;  %v438_v27 = vld [vmem:[#allocation18] sm:$0xff]  ;;  %s4282_s28 = sld [smem:[#allocation5 + $0x3]] }
  0xa4   :  { %3340 = vmatprep.subr.bf16.mxu1 %v3339_v14  ;;  %3049 = vmatprep.mubr.msk.f32.mxu1 %vm174_vm0, %v161_v9  ;;  %v437_v25 = vld [vmem:[%s4509_s9 + $0x18] sm:$0xff]  ;;  %v439_v28 = vld [vmem:[#allocation18 + $0x8] sm:$0xff]  ;;  %v442_v30 = vld [vmem:[#allocation19] sm:$0xff] }
  0xa5   :  { %v4079_v26 = vpack.c.bf16 %v437_v25, %v436_v24  ;;  %v443_v31 = vld [vmem:[#allocation19 + $0x8] sm:$0xff]  ;;  %v4085_v32 = vpack.c.bf16 %v439_v28, %v438_v27  ;;  %v440_v33 = vld [vmem:[#allocation18 + $0x10] sm:$0xff]  ;;  %v441_v34 = vld [vmem:[#allocation18 + $0x18] sm:$0xff]  ;;  %s460_s16 = scalar_lea.vmem [#allocation3], %s4130_s7  ;;  %s468_s0 = scalar_lea.vmem [#allocation4], %s4130_s7  ;;  %v718_v27 = vlaneseq }
  0xa6   :  { %3334 = vmatpush3.bf16.msra.mxu0 %v3331_v7  ;;  %v4090_v35 = vpack.c.bf16 %v443_v31, %v442_v30  ;;  %v444_v36 = vld [vmem:[#allocation19 + $0x10] sm:$0xff]  ;;  %v445_v37 = vld [vmem:[#allocation19 + $0x18] sm:$0xff]  ;;  %v4095_v38 = vpack.c.bf16 %v441_v34, %v440_v33  ;;  %s448_s2 = scalar_lea.vmem [#allocation2], %s4132_s24  ;;  %s466_s26 = scalar_lea.vmem [#allocation4], %s4132_s24  ;;  %v3853_v24 = vmov 1966171168  }
  0xa7   :  { %3342 = vmatpush3.bf16.msra.mxu1 %v3339_v14  ;;  %3344 = vmatprep.subr.bf16.mxu0 %v3343_v15  ;;  %v4101_v39 = vpack.c.bf16 %v445_v37, %v444_v36  ;;  %v2830_v40 = vld [vmem:[%s4505_s5] ss:$0 sm:$0xff]  ;;  %s451_s5 = scalar_lea.vmem [#allocation2], %s4130_s7  ;;  %v4146_v12 = vld [vmem:[#allocation16] ss:$0 sm:$0xff]  ;;  %v716_v25 = vunpack.c.l.s4 %v3853_v24  ;;  %v719_v31 = vshrl.u32 %v718_v27, 7 }
  0xa8   :  { %3351 = vmatprep.subr.bf16.mxu1 %v3850_v23  ;;  %v2833_v41 = vld [vmem:[%s4506_s6] ss:$0 sm:$0xff]  ;;  %s458_s6 = scalar_lea.vmem [#allocation3], %s4132_s24  ;;  %s746_s25 = scalar_lea.vmem [#allocation2], %s4186_s17 }
  0xa9   :  { %3039 = vmatmul.mubr.msk.f32.vlgmr.msra.gmra.mrb[0].mxu0 %vm174_vm0, %v162_v20  ;;  %v2836_v50 = vld [vmem:[#allocation15] ss:$0 sm:$0xff]  ;;  %v717_v30 = vunpack.c.0.s8 %v716_v25  ;;  %s754_s3 = scalar_lea.vmem [#allocation3], %s4186_s17  ;;  %s752_s19 = scalar_lea.vmem [#allocation3], %s4188_s23 }
  0xaa   :  { %3346 = vmatpush3.bf16.msra.mxu0 %v3343_v15  ;;  %3050 = vmatmul.mubr.msk.f32.vlgmr.msra.gmra.mrb[0].mxu1 %vm174_vm0, %v162_v20  ;;  %s743_s10 = scalar_lea.vmem [#allocation2], %s4188_s23  ;;  %s762_s27 = scalar_lea.vmem [#allocation4], %s4186_s17 }
  0xab   :  { %3348 = vmatprep.subr.bf16.mxu0 %v3347_v21  ;;  %3353 = vmatpush3.bf16.msra.mxu1 %v4067_v22  ;;  %s760_s11 = scalar_lea.vmem [#allocation4], %s4188_s23  ;;  %s1032_s8 = scalar_lea.vmem [#allocation2], %s4233_s29 }
  0xac   :  { %3354 = vmatprep.subr.bf16.mxu1 %v3850_v23  ;;  %3060 = vmatprep.mubr.msk.f32.mxu0 %vm174_vm0, %v161_v9  ;;  %s1040_s18 = scalar_lea.vmem [#allocation3], %s4233_s29  ;;  %s1038_s14 = scalar_lea.vmem [#allocation3], %s4235_s30 }
  0xad   :  { %3071 = vmatprep.mubr.msk.f32.mxu1 %vm3851_vm1, %v3852_v29  ;;  %s1029_s1 = scalar_lea.vmem [#allocation2], %s4235_s30  ;;  %s1048_s22 = scalar_lea.vmem [#allocation4], %s4233_s29 }
  0xae   :  { %3350 = vmatpush3.bf16.msra.mxu0 %v3347_v21  ;;  %s1046_s9 = scalar_lea.vmem [#allocation4], %s4235_s30  ;;  %s1318_s15 = scalar_lea.vmem [#allocation2], %s4280_s4 }
  0xaf   :  { %3356 = vmatpush3.bf16.msra.mxu1 %v4079_v26  ;;  %3357 = vmatprep.subr.bf16.mxu0 %v3850_v23  ;;  %s1326_s7 = scalar_lea.vmem [#allocation3], %s4280_s4  ;;  %s1324_s24 = scalar_lea.vmem [#allocation3], %s4282_s28 }
  0xb0   :  { %3363 = vmatprep.subr.bf16.mxu1 %v3850_v23 }
  0xb1   :  { %3061 = vmatmul.mubr.msk.f32.vlgmr.msra.gmra.mrb[2].mxu0 %vm174_vm0, %v162_v20 }
  0xb2   :  { %3359 = vmatpush3.bf16.msra.mxu0 %v4085_v32  ;;  %3072 = vmatmul.mubr.f32.vlgmr.msra.gmra.mrb[2].mxu1 %v3852_v29 }
  0xb3   :  { %3360 = vmatprep.subr.bf16.mxu0 %v3850_v23  ;;  %3082 = vmatprep.mubr.msk.f32.mxu0 %vm3851_vm1, %v3852_v29 }
  0xb4   :  { %3365 = vmatpush3.bf16.msra.mxu1 %v4090_v35  ;;  %3093 = vmatprep.mubr.msk.f32.mxu1 %vm3851_vm1, %v3852_v29 }
  0xb5   :  { %3366 = vmatprep.subr.bf16.mxu1 %v3850_v23 }
  0xb6   :  { %3362 = vmatpush3.bf16.msra.mxu0 %v4095_v38 }
  0xb7   :  { %3369 = vmatprep.subr.bf16.mxu0 %v3850_v23 }
  0xb8   :  { %3368 = vmatpush3.bf16.msra.mxu1 %v4101_v39 }
  0xb9   :  { %3083 = vmatmul.mubr.f32.vlgmr.msra.gmra.mrb[4].mxu0 %v3852_v29  ;;  %3375 = vmatprep.subr.bf16.mxu1 %v3850_v23 }
  0xba   :  { %3371 = vmatpush3.bf16.msra.mxu0 %v4067_v22  ;;  %3104 = vmatprep.mubr.msk.f32.mxu0 %vm3851_vm1, %v3852_v29 }
  0xbb   :  { %3094 = vmatmul.mubr.f32.vlgmr.msra.gmra.mrb[4].mxu1 %v3852_v29  ;;  %3372 = vmatprep.subr.bf16.mxu0 %v3850_v23 }
  0xbc   :  { %3377 = vmatpush3.bf16.msra.mxu1 %v4085_v32  ;;  %3115 = vmatprep.mubr.msk.f32.mxu1 %vm3851_vm1, %v3852_v29 }
  0xbd   :  { %3378 = vmatprep.subr.bf16.mxu1 %v3850_v23 }
  0xbe   :  { %3374 = vmatpush3.bf16.msra.mxu0 %v4079_v26 }
  0xbf   :  { %3381 = vmatprep.subr.bf16.mxu0 %v3850_v23 }
  0xc0   :  { %3380 = vmatpush3.bf16.msra.mxu1 %v4095_v38 }
  0xc1   :  { %3387 = vmatprep.subr.bf16.mxu1 %v3850_v23 }
 0x17c   :  { %v3040_v42 = vpop.f32.mrb[0].mxu0 }
 0x17d   :  { %v253_v43 = vadd.f32 %v3040_v42, %v2830_v40  ;;  %v247_v44 = vpop.f32.mrb[1].mxu0  ;;  %v3051_v45 = vpop.f32.mrb[0].mxu1 }
 0x17e   :  { %v248_v46 = vadd.f32 %v2830_v40, %v247_v44  ;;  %v341_v47 = vadd.f32 %v3051_v45, %v2833_v41  ;;  %v335_v48 = vpop.f32.mrb[1].mxu1  ;;  %v4152_v40 = vsub.s32 %v717_v30, %v719_v31 }
 0x17f   :  { %257 = vst.msk [vmem:[#allocation2 + $0x8] sm:$0xff] %vm174_vm0, %v253_v43  ;;  %v336_v49 = vadd.f32 %v2833_v41, %v335_v48 }
 0x180   :  { %256 = vst.msk [vmem:[#allocation2] sm:$0xff] %vm174_vm0, %v248_v46  ;;  %345 = vst.msk [vmem:[#allocation3 + $0x8] sm:$0xff] %vm174_vm0, %v341_v47 }
 0x181   :  { %344 = vst.msk [vmem:[#allocation3] sm:$0xff] %vm174_vm0, %v336_v49 }
 0x184   :  { %v3062_v51 = vpop.f32.mrb[2].mxu0 }
 0x185   :  { %v543_v52 = vpop.f32.mrb[2].mxu1  ;;  %v429_v53 = vadd.f32 %v3062_v51, %v2836_v50  ;;  %v423_v54 = vpop.f32.mrb[3].mxu0 }
 0x186   :  { %v3073_v55 = vpop.f32.mrb[3].mxu1  ;;  %v424_v56 = vadd.f32 %v2836_v50, %v423_v54 }
 0x187   :  { %v452_v57 = vld [vmem:[%s451_s5] sm:$0x1]  ;;  %433 = vst.msk [vmem:[#allocation4 + $0x8] sm:$0xff] %vm174_vm0, %v429_v53  ;;  %s1315_s5 = scalar_lea.vmem [#allocation2], %s4282_s28 }
 0x188   :  { %v454_v58 = vrot.slane %v452_v57, 7  ;;  %432 = vst.msk [vmem:[#allocation4] sm:$0xff] %vm174_vm0, %v424_v56  ;;  %v459_v59 = vld [vmem:[%s458_s6] sm:$0x1]  ;;  %s1334_s6 = scalar_lea.vmem [#allocation4], %s4280_s4 }
 0x189   :  { %v461_v60 = vld [vmem:[%s460_s16] sm:$0x1]  ;;  %s1332_s16 = scalar_lea.vmem [#allocation4], %s4282_s28 }
 0x18a   :  { %v449_v61 = vld [vmem:[%s448_s2] sm:$0x1]  ;;  %v463_v62 = vrot.slane %v461_v60, 7  ;;  %s4327_s2 = sld [smem:[#allocation5 + $0x84]] }
 0x18b   :  { %v457_v63 = vsel %vm456_vm2, %v449_v61, %v454_v58  ;;  %v747_v46 = vld [vmem:[%s746_s25] sm:$0x1] }
 0x18c   :  { %v617_v0 = vadd.f32 %v543_v52, %v457_v63  ;;  %v465_v1 = vsel %vm456_vm2, %v459_v59, %v463_v62  ;;  %v613_v2 = vpop.f32.mrb[4].mxu0  ;;  %v755_v47 = vld [vmem:[%s754_s3] sm:$0x1]  ;;  %v749_v48 = vrot.slane %v747_v46, 7 }
 0x18d   :  { %v3084_v4 = vpop.f32.mrb[5].mxu0  ;;  %v624_v5 = vadd.f32 %v613_v2, %v465_v1  ;;  %v757_v49 = vrot.slane %v755_v47, 7  ;;  %v753_v50 = vld [vmem:[%s752_s19] sm:$0x1] }
 0x18e   :  { %v2840_v3 = vmul.f32 -1.442695, %v617_v0  ;;  %v703_v6 = vpop.f32.mrb[4].mxu1  ;;  %v744_v51 = vld [vmem:[%s743_s10] sm:$0x1]  ;;  %s4374_s10 = sld [smem:[#allocation5 + $0x85]] }
 0x18f   :  { %v3095_v7 = vpop.f32.mrb[5].mxu1  ;;  %v2841_v8 = vmul.f32 -1.442695, %v624_v5  ;;  %v469_v13 = vld [vmem:[%s468_s0] sm:$0x1]  ;;  %v704_v15 = vadd.f32 %v4146_v12, %v703_v6  ;;  %v751_v52 = vsel %vm456_vm2, %v744_v51, %v749_v48  ;;  %v759_v54 = vsel %vm456_vm2, %v753_v50, %v757_v49  ;;  %s4329_s0 = sld [smem:[#allocation5 + $0x4]] }
 0x190   :  { %3512 = vpow2.f32 %v2840_v3  ;;  %v471_v16 = vrot.slane %v469_v13, 7  ;;  %v467_v17 = vld [vmem:[%s466_s26] sm:$0x1]  ;;  %s1604_s26 = scalar_lea.vmem [#allocation2], %s4327_s2  ;;  %s1612_s17 = scalar_lea.vmem [#allocation3], %s4327_s2 }
 0x191   :  { %3514 = vpow2.f32 %v2841_v8  ;;  %v763_v3 = vld [vmem:[%s762_s27] sm:$0x1]  ;;  %s1620_s3 = scalar_lea.vmem [#allocation4], %s4327_s2  ;;  %s4376_s27 = sld [smem:[#allocation5 + $0x5]] }
 0x192   :  { %v473_v20 = vsel %vm456_vm2, %v467_v17, %v471_v16  ;;  %v765_v5 = vrot.slane %v763_v3, 7  ;;  %v761_v6 = vld [vmem:[%s760_s11] sm:$0x1] }
 0x193   :  { %v1033_v25 = vld [vmem:[%s1032_s8] sm:$0x1] }
 0x194   :  { %v1041_v27 = vld [vmem:[%s1040_s18] sm:$0x1]  ;;  %s1890_s11 = scalar_lea.vmem [#allocation2], %s4374_s10  ;;  %s1898_s29 = scalar_lea.vmem [#allocation3], %s4374_s10 }
 0x195   :  { %v1043_v30 = vrot.slane %v1041_v27, 7  ;;  %v1039_v31 = vld [vmem:[%s1038_s14] sm:$0x1]  ;;  %s1610_s23 = scalar_lea.vmem [#allocation3], %s4329_s0  ;;  %s1601_s25 = scalar_lea.vmem [#allocation2], %s4329_s0 }
 0x196   :  { %s1618_s19 = scalar_lea.vmem [#allocation4], %s4329_s0  ;;  %s1906_s18 = scalar_lea.vmem [#allocation4], %s4374_s10 }
 0x197   :  { %s1896_s30 = scalar_lea.vmem [#allocation3], %s4376_s27  ;;  %s1887_s8 = scalar_lea.vmem [#allocation2], %s4376_s27 }
 0x198   :  { %s1904_s14 = scalar_lea.vmem [#allocation4], %s4376_s27 }
 0x19a   :  { %v3513_v9 = vpop.eup %3512 }
 0x19b   :  { %v621_v10 = vadd.f32 1.0, %v3513_v9  ;;  %v3515_v11 = vpop.eup %3514 }
 0x19c   :  { %v628_v14 = vadd.f32 1.0, %v3515_v11 }
 0x19d   :  { %3516 = vrcp.f32 %v621_v10  ;;  %v767_v10 = vsel %vm456_vm2, %v761_v6, %v765_v5 }
 0x19e   :  { %3518 = vrcp.f32 %v628_v14 }
 0x1a7   :  { %v3517_v18 = vpop.eup %3516 }
 0x1a8   :  { %v707_v19 = vmul.f32 %v3517_v18, %v704_v15  ;;  %v3519_v28 = vpop.eup %3518 }
 0x1a9   :  { %v710_v33 = vsub.f32 1.0, %v3519_v28  ;;  %v712_v37 = vmul.f32 0.0, %v3519_v28  ;;  %v1035_v28 = vrot.slane %v1033_v25, 7 }
 0x1aa   :  { %v708_v21 = vadd.f32 %v707_v19, %v473_v20 }
 0x1ac   :  { %3520 = vtanh.f32 %v708_v21 }
 0x1b6   :  { %v3521_v34 = vpop.eup %3520 }
 0x1b7   :  { %v711_v36 = vmul.f32 %v3521_v34, %v710_v33  ;;  %v1030_v33 = vld [vmem:[%s1029_s1] sm:$0x1]  ;;  %s4420_s1 = sld [smem:[#allocation5 + $0x86]] }
 0x1b8   :  { %v1037_v34 = vsel %vm456_vm2, %v1030_v33, %v1035_v28 }
 0x1b9   :  { %v4154_v41 = vadd.f32 %v712_v37, %v711_v36  ;;  %v1045_v37 = vsel %vm456_vm2, %v1039_v31, %v1043_v30 }
 0x1bb   :  { %v721_v42 = vrot.slane %v4154_v41, %v4152_v40  ;;  %3105 = vmatmul.mubr.msk.f32.vlgmr.msra.gmra.mrb[6].mxu0 %vm174_vm0, %v4154_v41  ;;  %3116 = vmatmul.mubr.msk.f32.vlgmr.msra.gmra.mrb[6].mxu1 %vm174_vm0, %v4154_v41 }
 0x1bc   :  { %3383 = vmatpush3.bf16.msra.mxu0 %v4090_v35  ;;  %3126 = vmatprep.mubr.msk.f32.mxu0 %vm3851_vm1, %v3852_v29 }
 0x1bd   :  { %v722_v43 = vcombine.high %v721_v42, %v721_v42  ;;  %v729_v44 = vrot.slane %v721_v42, %v4152_v40  ;;  %3384 = vmatprep.subr.bf16.mxu0 %v3850_v23  ;;  %3389 = vmatpush3.bf16.msra.mxu1 %v4067_v22  ;;  %s2184_s4 = scalar_lea.vmem [#allocation3], %s4420_s1 }
 0x1be   :  { %3390 = vmatprep.subr.bf16.mxu1 %v3850_v23  ;;  %3137 = vmatprep.mubr.msk.f32.mxu1 %vm3851_vm1, %v3852_v29 }
 0x1bf   :  { %v736_v45 = vrot.slane %v722_v43, %v4152_v40  ;;  %740 = vst.msk [vmem:[#allocation21] sm:$0x1] %vm739_vm3, %v729_v44 }
 0x1c0   :  { %3386 = vmatpush3.bf16.msra.mxu0 %v4101_v39 }
 0x1c1   :  { %741 = vst.msk [vmem:[#allocation21 + $0x8] sm:$0x1] %vm739_vm3, %v736_v45  ;;  %3393 = vmatprep.subr.bf16.mxu0 %v3850_v23  ;;  %3392 = vmatpush3.bf16.msra.mxu1 %v4079_v26 }
 0x1c2   :  { %3399 = vmatprep.subr.bf16.mxu1 %v3850_v23 }
 0x1c3   :  { %3127 = vmatmul.mubr.msk.f32.vlgmr.msra.gmra.mrb[8].mxu0 %vm174_vm0, %v4154_v41 }
 0x1c4   :  { %3395 = vmatpush3.bf16.msra.mxu0 %v4085_v32  ;;  %3148 = vmatprep.mubr.msk.f32.mxu0 %vm3851_vm1, %v3852_v29 }
 0x1c5   :  { %3396 = vmatprep.subr.bf16.mxu0 %v3850_v23 }
 0x1c8   :  { %3398 = vmatpush3.bf16.msra.mxu0 %v4095_v38 }
 0x1c9   :  { %3405 = vmatprep.subr.bf16.mxu0 %v3850_v23 }
 0x28e   :  { %v836_v53 = vpop.f32.mrb[6].mxu0  ;;  %v906_v55 = vpop.f32.mrb[6].mxu1 }
 0x28f   :  { %v910_v56 = vadd.f32 %v836_v53, %v751_v52  ;;  %v917_v57 = vadd.f32 %v906_v55, %v759_v54  ;;  %v3106_v58 = vpop.f32.mrb[7].mxu0  ;;  %v3117_v59 = vpop.f32.mrb[7].mxu1  ;;  %v1049_v53 = vld [vmem:[%s1048_s22] sm:$0x1]  ;;  %s4422_s22 = sld [smem:[#allocation5 + $0x6]] }
 0x290   :  { %v1051_v55 = vrot.slane %v1049_v53, 7 }
 0x291   :  { %v2847_v60 = vmul.f32 -1.442695, %v910_v56  ;;  %v2848_v61 = vmul.f32 -1.442695, %v917_v57  ;;  %v1047_v56 = vld [vmem:[%s1046_s9] sm:$0x1] }
 0x292   :  { %s2176_s9 = scalar_lea.vmem [#allocation2], %s4420_s1 }
 0x293   :  { %3522 = vpow2.f32 %v2847_v60  ;;  %v1053_v60 = vsel %vm456_vm2, %v1047_v56, %v1051_v55 }
 0x294   :  { %3524 = vpow2.f32 %v2848_v61 }
 0x295   :  { %s2182_s28 = scalar_lea.vmem [#allocation3], %s4422_s22 }
 0x296   :  { %v990_v62 = vpop.f32.mrb[8].mxu0 }
 0x297   :  { %v3128_v63 = vpop.f32.mrb[9].mxu0  ;;  %v991_v7 = vadd.f32 %v4146_v12, %v990_v62 }
 0x29d   :  { %v3523_v0 = vpop.eup %3522 }
 0x29e   :  { %v914_v1 = vadd.f32 1.0, %v3523_v0  ;;  %v3525_v2 = vpop.eup %3524 }
 0x29f   :  { %v921_v4 = vadd.f32 1.0, %v3525_v2 }
 0x2a0   :  { %3526 = vrcp.f32 %v914_v1 }
 0x2a1   :  { %3528 = vrcp.f32 %v921_v4 }
 0x2aa   :  { %v3527_v8 = vpop.eup %3526 }
 0x2ab   :  { %v994_v9 = vmul.f32 %v3527_v8, %v991_v7  ;;  %v3529_v13 = vpop.eup %3528  ;;  %v1319_v8 = vld [vmem:[%s1318_s15] sm:$0x1]  ;;  %s2173_s15 = scalar_lea.vmem [#allocation2], %s4422_s22 }
 0x2ac   :  { %v997_v14 = vsub.f32 1.0, %v3529_v13  ;;  %v999_v17 = vmul.f32 %v3529_v13, %v4154_v41  ;;  %v1325_v13 = vld [vmem:[%s1324_s24] sm:$0x1]  ;;  %s2190_s24 = scalar_lea.vmem [#allocation4], %s4422_s22 }
 0x2ad   :  { %v995_v11 = vadd.f32 %v994_v9, %v767_v10  ;;  %v1327_v9 = vld [vmem:[%s1326_s7] sm:$0x1]  ;;  %v1321_v10 = vrot.slane %v1319_v8, 7  ;;  %s2192_s7 = scalar_lea.vmem [#allocation4], %s4420_s1 }
 0x2af   :  { %3530 = vtanh.f32 %v995_v11  ;;  %v1329_v11 = vrot.slane %v1327_v9, 7 }
 0x2b9   :  { %v3531_v15 = vpop.eup %3530 }
 0x2ba   :  { %v998_v16 = vmul.f32 %v3531_v15, %v997_v14  ;;  %v1316_v14 = vld [vmem:[%s1315_s5] sm:$0x1]  ;;  %s4454_s5 = sld [smem:[#allocation5 + $0x87]] }
 0x2bb   :  { %v1323_v15 = vsel %vm456_vm2, %v1316_v14, %v1321_v10 }
 0x2bc   :  { %v4201_v18 = vadd.f32 %v999_v17, %v998_v16  ;;  %v1331_v17 = vsel %vm456_vm2, %v1325_v13, %v1329_v11 }
 0x2be   :  { %v1008_v19 = vrot.slane %v4201_v18, %v4152_v40  ;;  %3138 = vmatmul.mubr.msk.f32.vlgmr.msra.gmra.mrb[8].mxu1 %vm174_vm0, %v4201_v18  ;;  %3149 = vmatmul.mubr.msk.f32.vlgmr.msra.gmra.mrb[10].mxu0 %vm174_vm0, %v4201_v18 }
 0x2bf   :  { %3401 = vmatpush3.bf16.msra.mxu1 %v4090_v35  ;;  %3159 = vmatprep.mubr.msk.f32.mxu1 %vm3851_vm1, %v3852_v29 }
 0x2c0   :  { %v1009_v20 = vcombine.high %v1008_v19, %v1008_v19  ;;  %v1016_v21 = vrot.slane %v1008_v19, %v4152_v40  ;;  %3402 = vmatprep.subr.bf16.mxu1 %v3850_v23  ;;  %3407 = vmatpush3.bf16.msra.mxu0 %v4067_v22  ;;  %s2470_s2 = scalar_lea.vmem [#allocation3], %s4454_s5 }
 0x2c1   :  { %3408 = vmatprep.subr.bf16.mxu0 %v3850_v23  ;;  %3170 = vmatprep.mubr.msk.f32.mxu0 %vm3851_vm1, %v3852_v29 }
 0x2c2   :  { %v1023_v24 = vrot.slane %v1009_v20, %v4152_v40  ;;  %1026 = vst.msk [vmem:[#allocation21 + $0x1] sm:$0x1] %vm739_vm3, %v1016_v21 }
 0x2c3   :  { %3404 = vmatpush3.bf16.msra.mxu1 %v4101_v39 }
 0x2c4   :  { %1027 = vst.msk [vmem:[#allocation21 + $0x9] sm:$0x1] %vm739_vm3, %v1023_v24  ;;  %3411 = vmatprep.subr.bf16.mxu1 %v3850_v23  ;;  %3410 = vmatpush3.bf16.msra.mxu0 %v4079_v26 }
 0x2c5   :  { %3417 = vmatprep.subr.bf16.mxu0 %v3850_v23 }
 0x2c6   :  { %3160 = vmatmul.mubr.msk.f32.vlgmr.msra.gmra.mrb[10].mxu1 %vm174_vm0, %v4201_v18 }
 0x2c7   :  { %3413 = vmatpush3.bf16.msra.mxu1 %v4085_v32  ;;  %3181 = vmatprep.mubr.msk.f32.mxu1 %vm3851_vm1, %v3852_v29 }
 0x2c8   :  { %3414 = vmatprep.subr.bf16.mxu1 %v3850_v23 }
 0x2cb   :  { %3416 = vmatpush3.bf16.msra.mxu1 %v4095_v38 }
 0x2cc   :  { %3423 = vmatprep.subr.bf16.mxu1 %v3850_v23 }
 0x391   :  { %v1122_v36 = vpop.f32.mrb[8].mxu1  ;;  %v1192_v41 = vpop.f32.mrb[10].mxu0 }
 0x392   :  { %v1196_v42 = vadd.f32 %v1122_v36, %v1037_v34  ;;  %v1203_v43 = vadd.f32 %v1192_v41, %v1045_v37  ;;  %v3139_v44 = vpop.f32.mrb[9].mxu1  ;;  %v3150_v45 = vpop.f32.mrb[11].mxu0  ;;  %v1335_v36 = vld [vmem:[%s1334_s6] sm:$0x1]  ;;  %s4456_s6 = sld [smem:[#allocation5 + $0x7]] }
 0x393   :  { %v1337_v41 = vrot.slane %v1335_v36, 7 }
 0x394   :  { %v2854_v46 = vmul.f32 -1.442695, %v1196_v42  ;;  %v2855_v47 = vmul.f32 -1.442695, %v1203_v43  ;;  %v1333_v42 = vld [vmem:[%s1332_s16] sm:$0x1] }
 0x395   :  { %s2462_s16 = scalar_lea.vmem [#allocation2], %s4454_s5 }
 0x396   :  { %3532 = vpow2.f32 %v2854_v46  ;;  %v1339_v46 = vsel %vm456_vm2, %v1333_v42, %v1337_v41 }
 0x397   :  { %3534 = vpow2.f32 %v2855_v47 }
 0x398   :  { %s2468_s0 = scalar_lea.vmem [#allocation3], %s4456_s6 }
 0x399   :  { %v1276_v48 = vpop.f32.mrb[10].mxu1 }
 0x39a   :  { %v3161_v49 = vpop.f32.mrb[11].mxu1  ;;  %v1277_v57 = vadd.f32 %v4146_v12, %v1276_v48 }
 0x3a0   :  { %v3533_v50 = vpop.eup %3532 }
 0x3a1   :  { %v1200_v51 = vadd.f32 1.0, %v3533_v50  ;;  %v3535_v52 = vpop.eup %3534 }
 0x3a2   :  { %v1207_v54 = vadd.f32 1.0, %v3535_v52 }
 0x3a3   :  { %3536 = vrcp.f32 %v1200_v51 }
 0x3a4   :  { %3538 = vrcp.f32 %v1207_v54 }
 0x3ad   :  { %v3537_v58 = vpop.eup %3536 }
 0x3ae   :  { %v1280_v59 = vmul.f32 %v3537_v58, %v1277_v57  ;;  %v3539_v62 = vpop.eup %3538  ;;  %v1605_v58 = vld [vmem:[%s1604_s26] sm:$0x1]  ;;  %s2459_s26 = scalar_lea.vmem [#allocation2], %s4456_s6 }
 0x3af   :  { %v1283_v63 = vsub.f32 1.0, %v3539_v62  ;;  %v1285_v2 = vmul.f32 %v3539_v62, %v4201_v18  ;;  %v1611_v62 = vld [vmem:[%s1610_s23] sm:$0x1]  ;;  %s2476_s23 = scalar_lea.vmem [#allocation4], %s4456_s6 }
 0x3b0   :  { %v1281_v61 = vadd.f32 %v1280_v59, %v1053_v60  ;;  %v1613_v59 = vld [vmem:[%s1612_s17] sm:$0x1]  ;;  %v1607_v60 = vrot.slane %v1605_v58, 7  ;;  %s2478_s17 = scalar_lea.vmem [#allocation4], %s4454_s5 }
 0x3b2   :  { %3540 = vtanh.f32 %v1281_v61  ;;  %v1615_v61 = vrot.slane %v1613_v59, 7 }
 0x3bc   :  { %v3541_v0 = vpop.eup %3540 }
 0x3bd   :  { %v1284_v1 = vmul.f32 %v3541_v0, %v1283_v63  ;;  %v1602_v63 = vld [vmem:[%s1601_s25] sm:$0x1]  ;;  %s3854_s25 = smov [#allocation22]  }
 0x3be   :  { %v1609_v0 = vsel %vm456_vm2, %v1602_v63, %v1607_v60 }
 0x3bf   :  { %v4248_v3 = vadd.f32 %v1285_v2, %v1284_v1  ;;  %v1617_v2 = vsel %vm456_vm2, %v1611_v62, %v1615_v61 }
 0x3c1   :  { %v1294_v4 = vrot.slane %v4248_v3, %v4152_v40  ;;  %3171 = vmatmul.mubr.msk.f32.vlgmr.msra.gmra.mrb[12].mxu0 %vm174_vm0, %v4248_v3  ;;  %3182 = vmatmul.mubr.msk.f32.vlgmr.msra.gmra.mrb[12].mxu1 %vm174_vm0, %v4248_v3 }
 0x3c2   :  { %3419 = vmatpush3.bf16.msra.mxu0 %v4090_v35  ;;  %3192 = vmatprep.mubr.msk.f32.mxu0 %vm3851_vm1, %v3852_v29 }
 0x3c3   :  { %v1295_v5 = vcombine.high %v1294_v4, %v1294_v4  ;;  %v1302_v6 = vrot.slane %v1294_v4, %v4152_v40  ;;  %3420 = vmatprep.subr.bf16.mxu0 %v3850_v23  ;;  %3425 = vmatpush3.bf16.msra.mxu1 %v4067_v22 }
 0x3c4   :  { %3426 = vmatprep.subr.bf16.mxu1 %v3850_v23  ;;  %3203 = vmatprep.mubr.msk.f32.mxu1 %vm3851_vm1, %v3852_v29 }
 0x3c5   :  { %v1309_v7 = vrot.slane %v1295_v5, %v4152_v40  ;;  %1312 = vst.msk [vmem:[#allocation21 + $0x2] sm:$0x1] %vm739_vm3, %v1302_v6 }
 0x3c6   :  { %3422 = vmatpush3.bf16.msra.mxu0 %v4101_v39 }
 0x3c7   :  { %1313 = vst.msk [vmem:[#allocation21 + $0xa] sm:$0x1] %vm739_vm3, %v1309_v7  ;;  %3429 = vmatprep.subr.bf16.mxu0 %v3850_v23  ;;  %3428 = vmatpush3.bf16.msra.mxu1 %v4079_v26 }
 0x3c8   :  { %3435 = vmatprep.subr.bf16.mxu1 %v3850_v23 }
 0x3c9   :  { %3193 = vmatmul.mubr.msk.f32.vlgmr.msra.gmra.mrb[14].mxu0 %vm174_vm0, %v4248_v3 }
 0x3ca   :  { %3431 = vmatpush3.bf16.msra.mxu0 %v4085_v32  ;;  %3214 = vmatprep.mubr.msk.f32.mxu0 %vm3851_vm1, %v3852_v29 }
 0x3cb   :  { %3432 = vmatprep.subr.bf16.mxu0 %v3850_v23 }
 0x3ce   :  { %3434 = vmatpush3.bf16.msra.mxu0 %v4095_v38 }
 0x3cf   :  { %3441 = vmatprep.subr.bf16.mxu0 %v3850_v23 }
 0x494   :  { %v1408_v16 = vpop.f32.mrb[12].mxu0  ;;  %v1478_v18 = vpop.f32.mrb[12].mxu1 }
 0x495   :  { %v1482_v19 = vadd.f32 %v1408_v16, %v1323_v15  ;;  %v1489_v20 = vadd.f32 %v1478_v18, %v1331_v17  ;;  %v3172_v21 = vpop.f32.mrb[13].mxu0  ;;  %v3183_v24 = vpop.f32.mrb[13].mxu1  ;;  %v1621_v16 = vld [vmem:[%s1620_s3] sm:$0x1]  ;;  %s2764_s3 = sshll.u32 %s3854_s25, 4  ;;  %s2765_s3 = int_to_ptr.vmem [resolvable:$true] %s2764_s3 }
 0x496   :  { %v1623_v18 = vrot.slane %v1621_v16, 7  ;;  %s3779_s27 = scalar_lea.vmem %s2765_s3, 32  ;;  %p3784_p12 = scmp.lt.s32.totalorder %s2765_s3, %s2765_s3 }
 0x497   :  { %v2861_v25 = vmul.f32 -1.442695, %v1482_v19  ;;  %v2862_v27 = vmul.f32 -1.442695, %v1489_v20  ;;  %v1619_v19 = vld [vmem:[%s1618_s19] sm:$0x1]  ;;  %p3780_p11 = scmp.ne.s32.totalorder %s2765_s3, %s3779_s27  ;;  %p3785_p13 = scmp.lt.s32.totalorder %s3779_s27, %s3779_s27 }
 0x498   :  { %s3855_s19 = smov [#allocation21]  }
 0x499   :  { %3542 = vpow2.f32 %v2861_v25  ;;  %v1625_v25 = vsel %vm456_vm2, %v1619_v19, %v1623_v18  ;;  %s2751_s10 = sshll.u32 %s3855_s19, 4  ;;  %p3786_p0 = por %p3785_p13, %p3784_p12  ;;  %s2752_s10 = int_to_ptr.vmem [resolvable:$true] %s2751_s10 }
 0x49a   :  { %3544 = vpow2.f32 %v2862_v27 }
 0x49b   :  { %p3787_p1 = pnand %p3786_p0, %p3780_p11 }
 0x49c   :  { %v1562_v28 = vpop.f32.mrb[14].mxu0 }
 0x49d   :  { %v3194_v30 = vpop.f32.mrb[15].mxu0  ;;  %v1563_v43 = vadd.f32 %v4146_v12, %v1562_v28 }
 0x4a3   :  { %v3543_v31 = vpop.eup %3542 }
 0x4a4   :  { %v1486_v33 = vadd.f32 1.0, %v3543_v31  ;;  %v3545_v34 = vpop.eup %3544 }
 0x4a5   :  { %v1493_v37 = vadd.f32 1.0, %v3545_v34 }
 0x4a6   :  { %3546 = vrcp.f32 %v1486_v33 }
 0x4a7   :  { %3548 = vrcp.f32 %v1493_v37 }
 0x4b0   :  { %v3547_v44 = vpop.eup %3546 }
 0x4b1   :  { %v1566_v45 = vmul.f32 %v3547_v44, %v1563_v43  ;;  %v3549_v48 = vpop.eup %3548  ;;  %v1891_v44 = vld [vmem:[%s1890_s11] sm:$0x1] }
 0x4b2   :  { %v1569_v49 = vsub.f32 1.0, %v3549_v48  ;;  %v1571_v52 = vmul.f32 %v3549_v48, %v4248_v3  ;;  %v1897_v48 = vld [vmem:[%s1896_s30] sm:$0x1] }
 0x4b3   :  { %v1567_v47 = vadd.f32 %v1566_v45, %v1339_v46  ;;  %v1899_v45 = vld [vmem:[%s1898_s29] sm:$0x1]  ;;  %v1893_v46 = vrot.slane %v1891_v44, 7 }
 0x4b5   :  { %3550 = vtanh.f32 %v1567_v47  ;;  %v1901_v47 = vrot.slane %v1899_v45, 7 }
 0x4bf   :  { %v3551_v50 = vpop.eup %3550 }
 0x4c0   :  { %v1570_v51 = vmul.f32 %v3551_v50, %v1569_v49  ;;  %v1888_v49 = vld [vmem:[%s1887_s8] sm:$0x1] }
 0x4c1   :  { %v1895_v50 = vsel %vm456_vm2, %v1888_v49, %v1893_v46 }
 0x4c2   :  { %v4295_v53 = vadd.f32 %v1571_v52, %v1570_v51  ;;  %v1903_v52 = vsel %vm456_vm2, %v1897_v48, %v1901_v47  ;;  %v2193_v47 = vld [vmem:[%s2192_s7] sm:$0x1] }
 0x4c3   :  { %v2195_v49 = vrot.slane %v2193_v47, 7 }
 0x4c4   :  { %v1580_v54 = vrot.slane %v4295_v53, %v4152_v40  ;;  %3204 = vmatmul.mubr.msk.f32.vlgmr.msra.gmra.mrb[14].mxu1 %vm174_vm0, %v4295_v53  ;;  %3215 = vmatmul.mubr.msk.f32.vlgmr.msra.gmra.mrb[16].mxu0 %vm174_vm0, %v4295_v53 }
 0x4c5   :  { %3437 = vmatpush3.bf16.msra.mxu1 %v4090_v35  ;;  %3225 = vmatprep.mubr.msk.f32.mxu1 %vm3851_vm1, %v3852_v29 }
 0x4c6   :  { %v1581_v55 = vcombine.high %v1580_v54, %v1580_v54  ;;  %v1588_v56 = vrot.slane %v1580_v54, %v4152_v40  ;;  %3438 = vmatprep.subr.bf16.mxu1 %v3850_v23  ;;  %3443 = vmatpush3.bf16.msra.mxu0 %v4067_v22 }
 0x4c7   :  { %3444 = vmatprep.subr.bf16.mxu0 %v3850_v23  ;;  %3236 = vmatprep.mubr.msk.f32.mxu0 %vm3851_vm1, %v3852_v29 }
 0x4c8   :  { %v1595_v57 = vrot.slane %v1581_v55, %v4152_v40  ;;  %1598 = vst.msk [vmem:[#allocation21 + $0x3] sm:$0x1] %vm739_vm3, %v1588_v56 }
 0x4c9   :  { %3440 = vmatpush3.bf16.msra.mxu1 %v4101_v39 }
 0x4ca   :  { %1599 = vst.msk [vmem:[#allocation21 + $0xb] sm:$0x1] %vm739_vm3, %v1595_v57  ;;  %3447 = vmatprep.subr.bf16.mxu1 %v3850_v23  ;;  %3446 = vmatpush3.bf16.msra.mxu0 %v4079_v26 }
 0x4cb   :  { %3453 = vmatprep.subr.bf16.mxu0 %v3850_v23 }
 0x4cc   :  { %3226 = vmatmul.mubr.msk.f32.vlgmr.msra.gmra.mrb[16].mxu1 %vm174_vm0, %v4295_v53 }
 0x4cd   :  { %3449 = vmatpush3.bf16.msra.mxu1 %v4085_v32  ;;  %3247 = vmatprep.mubr.msk.f32.mxu1 %vm3851_vm1, %v3852_v29 }
 0x4ce   :  { %3450 = vmatprep.subr.bf16.mxu1 %v3850_v23 }
 0x4d1   :  { %3452 = vmatpush3.bf16.msra.mxu1 %v4095_v38 }
 0x4d2   :  { %3459 = vmatprep.subr.bf16.mxu1 %v3850_v23 }
 0x597   :  { %v1694_v1 = vpop.f32.mrb[14].mxu1  ;;  %v1764_v3 = vpop.f32.mrb[16].mxu0 }
 0x598   :  { %v1768_v4 = vadd.f32 %v1694_v1, %v1609_v0  ;;  %v1775_v5 = vadd.f32 %v1764_v3, %v1617_v2  ;;  %v3205_v6 = vpop.f32.mrb[15].mxu1  ;;  %v3216_v7 = vpop.f32.mrb[17].mxu0  ;;  %v1907_v1 = vld [vmem:[%s1906_s18] sm:$0x1] }
 0x599   :  { %v1909_v3 = vrot.slane %v1907_v1, 7 }
 0x59a   :  { %v2868_v8 = vmul.f32 -1.442695, %v1768_v4  ;;  %v2869_v9 = vmul.f32 -1.442695, %v1775_v5  ;;  %v1905_v4 = vld [vmem:[%s1904_s14] sm:$0x1] }
 0x59c   :  { %3552 = vpow2.f32 %v2868_v8  ;;  %v1911_v8 = vsel %vm456_vm2, %v1905_v4, %v1909_v3 }
 0x59d   :  { %3554 = vpow2.f32 %v2869_v9 }
 0x59f   :  { %v1848_v10 = vpop.f32.mrb[16].mxu1 }
 0x5a0   :  { %v3227_v11 = vpop.f32.mrb[17].mxu1  ;;  %v1849_v20 = vadd.f32 %v4146_v12, %v1848_v10 }
 0x5a6   :  { %v3553_v13 = vpop.eup %3552 }
 0x5a7   :  { %v1772_v14 = vadd.f32 1.0, %v3553_v13  ;;  %v3555_v15 = vpop.eup %3554 }
 0x5a8   :  { %v1779_v17 = vadd.f32 1.0, %v3555_v15 }
 0x5a9   :  { %3556 = vrcp.f32 %v1772_v14 }
 0x5aa   :  { %3558 = vrcp.f32 %v1779_v17 }
 0x5b3   :  { %v3557_v21 = vpop.eup %3556 }
 0x5b4   :  { %v1852_v24 = vmul.f32 %v3557_v21, %v1849_v20  ;;  %v3559_v28 = vpop.eup %3558 }
 0x5b5   :  { %v1855_v30 = vsub.f32 1.0, %v3559_v28  ;;  %v1857_v34 = vmul.f32 %v3559_v28, %v4295_v53 }
 0x5b6   :  { %v1853_v27 = vadd.f32 %v1852_v24, %v1625_v25  ;;  %v2183_v24 = vld [vmem:[%s2182_s28] sm:$0x1] }
 0x5b7   :  { %v2174_v25 = vld [vmem:[%s2173_s15] sm:$0x1] }
 0x5b8   :  { %3560 = vtanh.f32 %v1853_v27 }
 0x5c2   :  { %v3561_v31 = vpop.eup %3560 }
 0x5c3   :  { %v1856_v33 = vmul.f32 %v3561_v31, %v1855_v30 }
 0x5c5   :  { %v4342_v36 = vadd.f32 %v1857_v34, %v1856_v33 }
 0x5c7   :  { %v1866_v37 = vrot.slane %v4342_v36, %v4152_v40  ;;  %3237 = vmatmul.mubr.msk.f32.vlgmr.msra.gmra.mrb[18].mxu0 %vm174_vm0, %v4342_v36  ;;  %3248 = vmatmul.mubr.msk.f32.vlgmr.msra.gmra.mrb[18].mxu1 %vm174_vm0, %v4342_v36 }
 0x5c8   :  { %3455 = vmatpush3.bf16.msra.mxu0 %v4090_v35  ;;  %3258 = vmatprep.mubr.msk.f32.mxu0 %vm3851_vm1, %v3852_v29 }
 0x5c9   :  { %v1867_v41 = vcombine.high %v1866_v37, %v1866_v37  ;;  %v1874_v42 = vrot.slane %v1866_v37, %v4152_v40  ;;  %3456 = vmatprep.subr.bf16.mxu0 %v3850_v23  ;;  %3461 = vmatpush3.bf16.msra.mxu1 %v4067_v22 }
 0x5ca   :  { %3462 = vmatprep.subr.bf16.mxu1 %v3850_v23  ;;  %3269 = vmatprep.mubr.msk.f32.mxu1 %vm3851_vm1, %v3852_v29 }
 0x5cb   :  { %v1881_v43 = vrot.slane %v1867_v41, %v4152_v40  ;;  %1884 = vst.msk [vmem:[#allocation21 + $0x4] sm:$0x1] %vm739_vm3, %v1874_v42 }
 0x5cc   :  { %3458 = vmatpush3.bf16.msra.mxu0 %v4101_v39 }
 0x5cd   :  { %1885 = vst.msk [vmem:[#allocation21 + $0xc] sm:$0x1] %vm739_vm3, %v1881_v43  ;;  %3465 = vmatprep.subr.bf16.mxu0 %v3850_v23  ;;  %3464 = vmatpush3.bf16.msra.mxu1 %v4079_v26 }
 0x5ce   :  { %3471 = vmatprep.subr.bf16.mxu1 %v3850_v23 }
 0x5cf   :  { %3259 = vmatmul.mubr.msk.f32.vlgmr.msra.gmra.mrb[20].mxu0 %vm174_vm0, %v4342_v36 }
 0x5d0   :  { %3467 = vmatpush3.bf16.msra.mxu0 %v4085_v32  ;;  %3280 = vmatprep.mubr.msk.f32.mxu0 %vm3851_vm1, %v3852_v29 }
 0x5d1   :  { %3468 = vmatprep.subr.bf16.mxu0 %v3850_v23 }
 0x5d4   :  { %3470 = vmatpush3.bf16.msra.mxu0 %v4095_v38 }
 0x5d5   :  { %3477 = vmatprep.subr.bf16.mxu0 %v3850_v23 }
 0x69a   :  { %v1980_v51 = vpop.f32.mrb[18].mxu0  ;;  %v2050_v53 = vpop.f32.mrb[18].mxu1 }
 0x69b   :  { %v2054_v54 = vadd.f32 %v1980_v51, %v1895_v50  ;;  %v2061_v55 = vadd.f32 %v2050_v53, %v1903_v52  ;;  %v3238_v56 = vpop.f32.mrb[19].mxu0  ;;  %v3249_v57 = vpop.f32.mrb[19].mxu1  ;;  %v2191_v50 = vld [vmem:[%s2190_s24] sm:$0x1] }
 0x69d   :  { %v2875_v58 = vmul.f32 -1.442695, %v2054_v54  ;;  %v2876_v59 = vmul.f32 -1.442695, %v2061_v55  ;;  %v2197_v54 = vsel %vm456_vm2, %v2191_v50, %v2195_v49 }
 0x69f   :  { %3562 = vpow2.f32 %v2875_v58 }
 0x6a0   :  { %3564 = vpow2.f32 %v2876_v59 }
 0x6a2   :  { %v2134_v60 = vpop.f32.mrb[20].mxu0 }
 0x6a3   :  { %v3260_v61 = vpop.f32.mrb[21].mxu0  ;;  %v2135_v5 = vadd.f32 %v4146_v12, %v2134_v60 }
 0x6a9   :  { %v3563_v62 = vpop.eup %3562 }
 0x6aa   :  { %v2058_v63 = vadd.f32 1.0, %v3563_v62  ;;  %v3565_v0 = vpop.eup %3564 }
 0x6ab   :  { %v2065_v2 = vadd.f32 1.0, %v3565_v0 }
 0x6ac   :  { %3566 = vrcp.f32 %v2058_v63 }
 0x6ad   :  { %3568 = vrcp.f32 %v2065_v2  ;;  %v2460_v2 = vld [vmem:[%s2459_s26] sm:$0x1] }
 0x6b6   :  { %v3567_v6 = vpop.eup %3566 }
 0x6b7   :  { %v2138_v7 = vmul.f32 %v3567_v6, %v2135_v5  ;;  %v3569_v10 = vpop.eup %3568 }
 0x6b8   :  { %v2141_v11 = vsub.f32 1.0, %v3569_v10  ;;  %v2143_v15 = vmul.f32 %v3569_v10, %v4342_v36 }
 0x6b9   :  { %v2139_v9 = vadd.f32 %v2138_v7, %v1911_v8 }
 0x6bb   :  { %3570 = vtanh.f32 %v2139_v9 }
 0x6c5   :  { %v3571_v13 = vpop.eup %3570 }
 0x6c6   :  { %v2142_v14 = vmul.f32 %v3571_v13, %v2141_v11 }
 0x6c8   :  { %v4389_v16 = vadd.f32 %v2143_v15, %v2142_v14 }
 0x6ca   :  { %v2152_v17 = vrot.slane %v4389_v16, %v4152_v40  ;;  %3270 = vmatmul.mubr.msk.f32.vlgmr.msra.gmra.mrb[20].mxu1 %vm174_vm0, %v4389_v16  ;;  %3281 = vmatmul.mubr.msk.f32.vlgmr.msra.gmra.mrb[22].mxu0 %vm174_vm0, %v4389_v16 }
 0x6cb   :  { %3473 = vmatpush3.bf16.msra.mxu1 %v4090_v35  ;;  %3291 = vmatprep.mubr.msk.f32.mxu1 %vm3851_vm1, %v3852_v29 }
 0x6cc   :  { %v2153_v18 = vcombine.high %v2152_v17, %v2152_v17  ;;  %v2160_v19 = vrot.slane %v2152_v17, %v4152_v40  ;;  %3474 = vmatprep.subr.bf16.mxu1 %v3850_v23  ;;  %3479 = vmatpush3.bf16.msra.mxu0 %v4067_v22  ;;  %v2177_v22 = vld [vmem:[%s2176_s9] sm:$0x1] }
 0x6cd   :  { %3480 = vmatprep.subr.bf16.mxu0 %v3850_v23  ;;  %3302 = vmatprep.mubr.msk.f32.mxu0 %vm3851_vm1, %v3852_v29 }
 0x6ce   :  { %v2167_v20 = vrot.slane %v2153_v18, %v4152_v40  ;;  %2170 = vst.msk [vmem:[#allocation21 + $0x5] sm:$0x1] %vm739_vm3, %v2160_v19  ;;  %v2479_v19 = vld [vmem:[%s2478_s17] sm:$0x1] }
 0x6cf   :  { %3476 = vmatpush3.bf16.msra.mxu1 %v4101_v39 }
 0x6d0   :  { %2171 = vst.msk [vmem:[#allocation21 + $0xd] sm:$0x1] %vm739_vm3, %v2167_v20  ;;  %3483 = vmatprep.subr.bf16.mxu1 %v3850_v23  ;;  %3482 = vmatpush3.bf16.msra.mxu0 %v4079_v26  ;;  %v2185_v26 = vld [vmem:[%s2184_s4] sm:$0x1] }
 0x6d1   :  { %3489 = vmatprep.subr.bf16.mxu0 %v3850_v23  ;;  %v2187_v21 = vrot.slane %v2185_v26, 7  ;;  %v2477_v26 = vld [vmem:[%s2476_s23] sm:$0x1] }
 0x6d2   :  { %3292 = vmatmul.mubr.msk.f32.vlgmr.msra.gmra.mrb[22].mxu1 %vm174_vm0, %v4389_v16 }
 0x6d3   :  { %3485 = vmatpush3.bf16.msra.mxu1 %v4085_v32  ;;  %3313 = vmatprep.mubr.msk.f32.mxu1 %vm3851_vm1, %v3852_v29  ;;  %v2179_v32 = vrot.slane %v2177_v22, 7  ;;  %v2189_v28 = vsel %vm456_vm2, %v2183_v24, %v2187_v21  ;;  %v2481_v22 = vrot.slane %v2479_v19, 7 }
 0x6d4   :  { %3486 = vmatprep.subr.bf16.mxu1 %v3850_v23 }
 0x6d7   :  { %3488 = vmatpush3.bf16.msra.mxu1 %v4095_v38  ;;  %v2181_v38 = vsel %vm456_vm2, %v2174_v25, %v2179_v32  ;;  %v3592_v32 = vld [vmem:[#allocation16] ss:$0 sm:$0xff] }
 0x79d   :  { %v2266_v27 = vpop.f32.mrb[20].mxu1  ;;  %v2336_v30 = vpop.f32.mrb[22].mxu0 }
 0x79e   :  { %v2340_v31 = vadd.f32 %v2266_v27, %v2181_v38  ;;  %v2347_v33 = vadd.f32 %v2336_v30, %v2189_v28  ;;  %v3271_v34 = vpop.f32.mrb[21].mxu1  ;;  %v3282_v36 = vpop.f32.mrb[23].mxu0  ;;  %v2483_v38 = vsel %vm456_vm2, %v2477_v26, %v2481_v22 }
 0x7a0   :  { %v2882_v37 = vmul.f32 -1.442695, %v2340_v31  ;;  %v2883_v41 = vmul.f32 -1.442695, %v2347_v33 }
 0x7a2   :  { %3572 = vpow2.f32 %v2882_v37 }
 0x7a3   :  { %3574 = vpow2.f32 %v2883_v41 }
 0x7a5   :  { %v2420_v42 = vpop.f32.mrb[22].mxu1 }
 0x7a6   :  { %v3293_v43 = vpop.f32.mrb[23].mxu1  ;;  %v2421_v51 = vadd.f32 %v4146_v12, %v2420_v42 }
 0x7ac   :  { %v3573_v44 = vpop.eup %3572 }
 0x7ad   :  { %v2344_v45 = vadd.f32 1.0, %v3573_v44  ;;  %v3575_v46 = vpop.eup %3574 }
 0x7ae   :  { %v2351_v48 = vadd.f32 1.0, %v3575_v46 }
 0x7af   :  { %3576 = vrcp.f32 %v2344_v45 }
 0x7b0   :  { %3578 = vrcp.f32 %v2351_v48 }
 0x7b9   :  { %v3577_v52 = vpop.eup %3576 }
 0x7ba   :  { %v2424_v53 = vmul.f32 %v3577_v52, %v2421_v51  ;;  %v3579_v56 = vpop.eup %3578 }
 0x7bb   :  { %v2427_v57 = vsub.f32 1.0, %v3579_v56  ;;  %v2429_v60 = vmul.f32 %v3579_v56, %v4389_v16 }
 0x7bc   :  { %v2425_v55 = vadd.f32 %v2424_v53, %v2197_v54 }
 0x7be   :  { %3580 = vtanh.f32 %v2425_v55 }
 0x7c8   :  { %v3581_v58 = vpop.eup %3580 }
 0x7c9   :  { %v2428_v59 = vmul.f32 %v3581_v58, %v2427_v57 }
 0x7cb   :  { %v4435_v61 = vadd.f32 %v2429_v60, %v2428_v59 }
 0x7cd   :  { %v2438_v62 = vrot.slane %v4435_v61, %v4152_v40  ;;  %3303 = vmatmul.mubr.msk.f32.vlgmr.msra.gmra.mrb[24].mxu0 %vm174_vm0, %v4435_v61  ;;  %3314 = vmatmul.mubr.msk.f32.vlgmr.msra.gmra.mrb[24].mxu1 %vm174_vm0, %v4435_v61 }
 0x7ce   :  { %3491 = vmatpush3.bf16.msra.mxu0 %v4090_v35  ;;  %3324 = vmatprep.mubr.msk.f32.mxu0 %vm3851_vm1, %v3852_v29  ;;  %v2471_v29 = vld [vmem:[%s2470_s2] sm:$0x1] }
 0x7cf   :  { %v2439_v12 = vcombine.high %v2438_v62, %v2438_v62  ;;  %v2446_v63 = vrot.slane %v2438_v62, %v4152_v40  ;;  %3492 = vmatprep.subr.bf16.mxu0 %v3850_v23  ;;  %v2463_v23 = vld [vmem:[%s2462_s16] sm:$0x1]  ;;  %v2473_v1 = vrot.slane %v2471_v29, 7 }
 0x7d0   :  { %v2465_v35 = vrot.slane %v2463_v23, 7 }
 0x7d1   :  { %v2453_v0 = vrot.slane %v2439_v12, %v4152_v40  ;;  %2456 = vst.msk [vmem:[#allocation21 + $0x6] sm:$0x1] %vm739_vm3, %v2446_v63 }
 0x7d2   :  { %3494 = vmatpush3.bf16.msra.mxu0 %v4101_v39  ;;  %v2469_v39 = vld [vmem:[%s2468_s0] sm:$0x1]  ;;  %v2467_v3 = vsel %vm456_vm2, %v2460_v2, %v2465_v35 }
 0x7d3   :  { %2457 = vst.msk [vmem:[#allocation21 + $0xe] sm:$0x1] %vm739_vm3, %v2453_v0  ;;  %v2475_v5 = vsel %vm456_vm2, %v2469_v39, %v2473_v1 }
 0x7d5   :  { %3325 = vmatmul.mubr.msk.f32.vlgmr.msra.gmra.mrb[26].mxu0 %vm174_vm0, %v4435_v61 }
 0x8a0   :  { %v2552_v4 = vpop.f32.mrb[24].mxu0  ;;  %v2622_v6 = vpop.f32.mrb[24].mxu1 }
 0x8a1   :  { %v2626_v7 = vadd.f32 %v2552_v4, %v2467_v3  ;;  %v2633_v8 = vadd.f32 %v2622_v6, %v2475_v5  ;;  %v3304_v9 = vpop.f32.mrb[25].mxu0  ;;  %v3315_v10 = vpop.f32.mrb[25].mxu1 }
 0x8a3   :  { %v2889_v11 = vmul.f32 -1.442695, %v2626_v7  ;;  %v2890_v13 = vmul.f32 -1.442695, %v2633_v8 }
 0x8a5   :  { %3582 = vpow2.f32 %v2889_v11 }
 0x8a6   :  { %3584 = vpow2.f32 %v2890_v13 }
 0x8a8   :  { %v2706_v14 = vpop.f32.mrb[26].mxu0 }
 0x8a9   :  { %v3326_v15 = vpop.f32.mrb[27].mxu0  ;;  %v2707_v21 = vadd.f32 %v3592_v32, %v2706_v14 }
 0x8af   :  { %v3583_v16 = vpop.eup %3582 }
 0x8b0   :  { %v2630_v17 = vadd.f32 1.0, %v3583_v16  ;;  %v3585_v18 = vpop.eup %3584 }
 0x8b1   :  { %v2637_v20 = vadd.f32 1.0, %v3585_v18 }
 0x8b2   :  { %3586 = vrcp.f32 %v2630_v17 }
 0x8b3   :  { %3588 = vrcp.f32 %v2637_v20 }
 0x8bc   :  { %v3587_v24 = vpop.eup %3586 }
 0x8bd   :  { %v2710_v25 = vmul.f32 %v3587_v24, %v2707_v21  ;;  %v3589_v28 = vpop.eup %3588 }
 0x8be   :  { %v2713_v30 = vsub.f32 1.0, %v3589_v28  ;;  %v2715_v33 = vmul.f32 %v3589_v28, %v4435_v61 }
 0x8bf   :  { %v2711_v27 = vadd.f32 %v2710_v25, %v2483_v38 }
 0x8c1   :  { %3590 = vtanh.f32 %v2711_v27 }
 0x8cb   :  { %v3591_v31 = vpop.eup %3590 }
 0x8cc   :  { %v2714_v34 = vmul.f32 %v3591_v31, %v2713_v30 }
 0x8ce   :  { %v2716_v36 = vadd.f32 %v2715_v33, %v2714_v34 }
 0x8d0   :  { %v2724_v37 = vrot.slane %v2716_v36, %v4152_v40  ;;  %2745 = vst.msk [vmem:[#allocation22] sm:$0x3] %vm2744_vm4, %v2716_v36 }
 0x8d1   :  { %3790 = shalt.err (!%p3787_p1)
}
 0x8d2   :  { %s3791_s30 = scalar_lea.hbm %s4513_s13, 32 }
 0x8d3   :  { %p3792_p2 = scmp.ne.s32.totalorder %s4513_s13, %s3791_s30  ;;  %p3795_p3 = scmp.lt.u32.totalorder %s3791_s30, %s4513_s13 }
 0x8d5   :  { %p3797_p4 = pnand %p3795_p3, %p3792_p2 }
 0x8d7   :  { %3800 = shalt.err (!%p3797_p4)
}
 0x8d8   :  { %2767 = dma.vmem_to_hbm [thread:$0]  %s2765_s3, 32, %s4513_s13, [#allocation23]   ;;  %v2725_v41 = vcombine.high %v2724_v37, %v2724_v37  ;;  %v2732_v42 = vrot.slane %v2724_v37, %v4152_v40 }
 0x8d9   :  { %s3801_s4 = scalar_lea.vmem %s2752_s10, 256  ;;  %p3806_p6 = scmp.lt.s32.totalorder %s2752_s10, %s2752_s10 }
 0x8da   :  { %v2739_v43 = vrot.slane %v2725_v41, %v4152_v40  ;;  %2742 = vst.msk [vmem:[#allocation21 + $0x7] sm:$0x1] %vm739_vm3, %v2732_v42  ;;  %p3802_p5 = scmp.ne.s32.totalorder %s2752_s10, %s3801_s4  ;;  %p3807_p7 = scmp.lt.s32.totalorder %s3801_s4, %s3801_s4 }
 0x8dc   :  { %2743 = vst.msk [vmem:[#allocation21 + $0xf] sm:$0x1] %vm739_vm3, %v2739_v43  ;;  %p3808_p8 = por %p3807_p7, %p3806_p6 }
 0x8de   :  { %p3809_p9 = pnand %p3808_p8, %p3802_p5 }
 0x8e0   :  { %3812 = shalt.err (!%p3809_p9)
}
 0x8e1   :  { %s3813_s13 = scalar_lea.hbm %s4512_s12, 256 }
 0x8e2   :  { %p3814_p10 = scmp.ne.s32.totalorder %s4512_s12, %s3813_s13  ;;  %p3817_p11 = scmp.lt.u32.totalorder %s3813_s13, %s4512_s12 }
 0x8e4   :  { %p3819_p12 = pnand %p3817_p11, %p3814_p10 }
 0x8e6   :  { %3822 = shalt.err (!%p3819_p12)
}
 0x8e7   :  { %2757 = dma.vmem_to_hbm [thread:$0]  %s2752_s10, 256, %s4512_s12, [#allocation7], %s3841_s20, %s3841_s20, %s3842_s21  }
 0x8e8   :  { %3835 = dma.done.wait [#allocation7], 256  }
 0x8e9   :  { %3836 = vsyncadd [#allocation7], 4294967040 }
 0x8ea   :  { %3837 = dma.done.wait [#allocation23], 32  }
 0x8eb   :  { %3838 = vsyncadd [#allocation23], 4294967264 }
 0x8ec   :  { %2774 = vsyncpa [#allocation6], 1 }
 0x8ed   :  { %2775 = vsyncpa [#allocation11], 1 }
 0x8ee   :  { %2776 = vsyncpa [#allocation14], 1 }
 0x8ef   :  { %2777 = vsyncpa [#allocation17], 1 }
 0x8f0   :  { %2778 = vsyncpa [#allocation20], 1 }
 0x8f1   :  { %2779 = vsyncpa [#allocation7], 1 }
 0x8f2   :  { %2780 = vsyncpa [#allocation23], 1 }
 0x8f3   :  { %2781 = vsyncpa [#allocation8], 1 }

</bundles_post_ra>
